<compile_context>
chip_gen: v6e
topology: v6e:2x2x1
jax: 0.10.0
libtpu: 0.0.40
codegen_flags: <defaults>
</compile_context>

<pallas_src>
import functools

import jax
import jax.numpy as jnp
from jax.experimental import pallas as pl
from jax.experimental.pallas import tpu as pltpu


# ---------------------------------------------------------------------------
# Small helpers
# ---------------------------------------------------------------------------

def _round_up(x, m):
    return ((x + m - 1) // m) * m


def _choose_chunk(seq_len, max_chunk=32):
    """Largest divisor of seq_len <= max_chunk (time steps per grid step)."""
    t = min(seq_len, max_chunk)
    while seq_len % t:
        t -= 1
    return t


def _choose_unroll(steps, hidden_pad):
    """Full unroll only while the per-step live set is small; else partial."""
    if hidden_pad <= 512:
        return steps
    for u in (4, 2, 1):
        if steps % u == 0:
            return u
    return 1


def _pad_gate_params(w_a, w_x, b_gates, hidden, hidden_pad):
    """Re-pack stacked gate weights so every gate owns a 128-aligned lane slot.

    Padded rows/columns are zero, which keeps the padded hidden lanes exactly
    zero throughout the recurrence (candidate tanh(0)=0, c starts at 0).
    """
    in_dim = w_x.shape[0]
    w_a_p = jnp.zeros((hidden_pad, 4 * hidden_pad), jnp.float32)
    w_x_p = jnp.zeros((in_dim, 4 * hidden_pad), jnp.float32)
    b_p = jnp.zeros((1, 4 * hidden_pad), jnp.float32)
    for g in range(4):
        src = slice(g * hidden, (g + 1) * hidden)
        dst = slice(g * hidden_pad, g * hidden_pad + hidden)
        w_a_p = w_a_p.at[:hidden, dst].set(w_a[:, src])
        w_x_p = w_x_p.at[:, dst].set(w_x[:, src])
        b_p = b_p.at[:, dst].set(b_gates[:, src])
    return w_a_p, w_x_p, b_p


def _vmem_limit_bytes(T, Bp, D, Hp, Op):
    """Explicit scoped-VMEM budget: actual buffers + headroom, <= 64 MiB."""
    G = 4 * Hp
    streamed = 2 * (T * Bp * D * 2            # x chunk (bf16, double-buffered)
                    + T * Bp * Op * 4)        # y chunk (f32, double-buffered)
    resident = 2 * (D * G * 2 + G * 4         # W_x (bf16) + gate bias (f32)
                    + Hp * Op * 2 + Op * 4)   # W_pred (bf16) + pred bias (f32)
    scratch = (Hp * G * 2                     # resident W_a (bf16, single buf)
               + T * Bp * G * 4               # per-chunk x projection (f32)
               + 2 * Bp * Hp * 4)             # a / c carries (f32)
    budget = streamed + resident + scratch
    return int(min(max(2 * budget + (1 << 20), 32 << 20), 64 << 20))


# ---------------------------------------------------------------------------
# Fused Pallas kernel: input projection + LSTM recurrence + prediction
# ---------------------------------------------------------------------------

def _fused_lstm_kernel(x_ref, wx_ref, bg_ref, wa_hbm, wp_ref, bp_ref,   # inputs
                       y_ref,                                            # output
                       wa_sc, xp_sc, a_sc, c_sc, wa_sem,                 # scratch
                       *, hidden, steps, batch_pad, unroll):
    """One grid step == `steps` time steps of the LSTM, fully fused.

    x_ref  : (steps*Bp, D)   bf16   time-major embedded inputs for this chunk
    wx_ref : (D, 4*Hp)       bf16   input-projection weights (resident)
    bg_ref : (1, 4*Hp)       f32    gate bias
    wa_hbm : (Hp, 4*Hp)      bf16   recurrent weights in HBM (pl.ANY)
    wp_ref : (Hp, Op)        bf16   prediction weights (Op = O padded to 128)
    bp_ref : (1, Op)         f32    prediction bias
    y_ref  : (steps, Bp, Op) f32    lane-dense prediction output chunk
    wa_sc  : (Hp, 4*Hp)      bf16   single-buffered resident copy of W_a
    xp_sc  : (steps*Bp, 4Hp) f32    per-chunk input projection
    a_sc/c_sc : (Bp, Hp)     f32    hidden / cell carries across grid chunks
    """
    g = pl.program_id(0)
    H = hidden
    Bp = batch_pad

    @pl.when(g == 0)
    def _init():
        a_sc[...] = jnp.zeros_like(a_sc)
        c_sc[...] = jnp.zeros_like(c_sc)
        # Single-buffer the big recurrent weight: one HBM->VMEM DMA, reused by
        # every grid chunk (no double-buffered copy of W_a in VMEM).
        cp = pltpu.make_async_copy(wa_hbm, wa_sc, wa_sem)
        cp.start()
        cp.wait()

    # ---- Fused input projection for the whole chunk: one wide MXU pass. ----
    # bf16 x bf16 -> f32 accumulate; result stays in VMEM scratch (no HBM trip).
    xp_sc[...] = (jnp.dot(x_ref[...], wx_ref[...],
                          preferred_element_type=jnp.float32) + bg_ref[...])

    bp = bp_ref[...]                                       # (1, Op) f32

    def step(t, carry):
        a, c = carry                                       # f32 carries
        row0 = pl.multiple_of(t * Bp, Bp)
        gates = (jnp.dot(a.astype(jnp.bfloat16), wa_sc[...],
                         preferred_element_type=jnp.float32)
                 + xp_sc[pl.ds(row0, Bp), :])              # (Bp, 4*Hp) f32
        # sigmoid(x) = 0.5*(tanh(0.5*x)+1): one EUP pass per gate.
        ft = 0.5 * (jnp.tanh(0.5 * gates[:, 0 * H:1 * H]) + 1.0)   # forget
        it = 0.5 * (jnp.tanh(0.5 * gates[:, 1 * H:2 * H]) + 1.0)   # update
        ot = 0.5 * (jnp.tanh(0.5 * gates[:, 2 * H:3 * H]) + 1.0)   # output
        cct = jnp.tanh(gates[:, 3 * H:4 * H])                      # candidate
        c_next = ft * c + it * cct
        a_next = ot * jnp.tanh(c_next)                     # dropout == identity
        # ---- Fused, lane-dense prediction store (Op = 128): no h_tm trip. ----
        y_ref[t] = (jnp.dot(a_next.astype(jnp.bfloat16), wp_ref[...],
                            preferred_element_type=jnp.float32) + bp)
        return (a_next, c_next)

    a_fin, c_fin = jax.lax.fori_loop(0, steps, step,
                                     (a_sc[...], c_sc[...]), unroll=unroll)
    a_sc[...] = a_fin
    c_sc[...] = c_fin


# ---------------------------------------------------------------------------
# Forward wrapper
# ---------------------------------------------------------------------------

def uni_lstm_forward(tokens, word_embeddings, w_a, w_x, b_gates, w_pred, b_pred):
    """tokens: (B, S) int32; returns y_pred: (B, S, O) float32."""
    B, S = tokens.shape
    D = word_embeddings.shape[1]
    H = w_a.shape[0]
    O = w_pred.shape[1]

    Hp = _round_up(H, 128)        # lane-align hidden dim (gate slots at k*128)
    Bp = _round_up(B, 8)          # sublane-align batch
    Op = _round_up(O, 128)        # lane-dense prediction output
    T = _choose_chunk(S)          # time steps per grid invocation
    G = 4 * Hp

    # Time-major embedding gather, cast to bf16 before it ever hits HBM.
    x_tm = jnp.take(word_embeddings, tokens.T, axis=0).astype(jnp.bfloat16)  # (S,B,D)
    if Bp != B:
        x_tm = jnp.pad(x_tm, ((0, 0), (0, Bp - B), (0, 0)))                  # (S,Bp,D)
    x2d = x_tm.reshape(S * Bp, D)   # 2-D so the in-kernel chunk matmul needs no reshape

    # Lane-aligned, zero-padded parameter repack; MXU operands in bf16.
    w_a_p, w_x_p, b_p = _pad_gate_params(w_a, w_x, b_gates, H, Hp)
    w_a_bf = w_a_p.astype(jnp.bfloat16)
    w_x_bf = w_x_p.astype(jnp.bfloat16)
    w_pred_bf = (jnp.zeros((Hp, Op), jnp.float32)
                 .at[:H, :O].set(w_pred).astype(jnp.bfloat16))
    b_pred_p = jnp.zeros((1, Op), jnp.float32).at[:, :O].set(b_pred)

    kernel = functools.partial(
        _fused_lstm_kernel, hidden=Hp, steps=T, batch_pad=Bp,
        unroll=_choose_unroll(T, Hp))

    y_tm = pl.pallas_call(
        kernel,
        out_shape=jax.ShapeDtypeStruct((S, Bp, Op), jnp.float32),
        grid_spec=pltpu.PrefetchScalarGridSpec(
            num_scalar_prefetch=0,
            grid=(S // T,),
            in_specs=[
                pl.BlockSpec((T * Bp, D), lambda g: (g, 0)),   # x chunk (bf16)
                pl.BlockSpec((D, G), lambda g: (0, 0)),        # W_x (resident)
                pl.BlockSpec((1, G), lambda g: (0, 0)),        # gate bias
                pl.BlockSpec(memory_space=pl.ANY),             # W_a stays in HBM
                pl.BlockSpec((Hp, Op), lambda g: (0, 0)),      # W_pred (resident)
                pl.BlockSpec((1, Op), lambda g: (0, 0)),       # pred bias
            ],
            out_specs=pl.BlockSpec((T, Bp, Op), lambda g: (g, 0, 0)),
            scratch_shapes=[
                pltpu.VMEM((Hp, G), jnp.bfloat16),     # resident W_a (single buf)
                pltpu.VMEM((T * Bp, G), jnp.float32),  # per-chunk x projection
                pltpu.VMEM((Bp, Hp), jnp.float32),     # a carry
                pltpu.VMEM((Bp, Hp), jnp.float32),     # c carry
                pltpu.SemaphoreType.DMA,               # W_a load semaphore
            ],
        ),
        compiler_params=pltpu.CompilerParams(
            dimension_semantics=("arbitrary",),        # serial recurrence
            vmem_limit_bytes=_vmem_limit_bytes(T, Bp, D, Hp, Op),
        ),
    )(x2d, w_x_bf, b_p, w_a_bf, w_pred_bf, b_pred_p)

    y = y_tm[:, :B, :O]                                # (S, B, O)
    return jnp.transpose(y, (1, 0, 2))                 # (B, S, O)


# ---------------------------------------------------------------------------
# Pure-JAX reference (mirrors the PyTorch forward, all-f32)
# ---------------------------------------------------------------------------

def _ref_forward(tokens, word_embeddings, w_a, w_x, b_gates, w_pred, b_pred):
    x_emb = jnp.take(word_embeddings, tokens, axis=0).astype(jnp.float32)
    B, S, D = x_emb.shape
    H = w_a.shape[0]

    def step(carry, xt):
        a, c = carry
        gates = a @ w_a + xt @ w_x + b_gates
        ft = jax.nn.sigmoid(gates[:, 0 * H:1 * H])
        it = jax.nn.sigmoid(gates[:, 1 * H:2 * H])
        ot = jax.nn.sigmoid(gates[:, 2 * H:3 * H])
        cct = jnp.tanh(gates[:, 3 * H:4 * H])
        c_next = ft * c + it * cct
        a_next = ot * jnp.tanh(c_next)
        yt = a_next @ w_pred + b_pred
        return (a_next, c_next), yt

    init = (jnp.zeros((B, H), jnp.float32), jnp.zeros((B, H), jnp.float32))
    _, ys = jax.lax.scan(step, init, jnp.transpose(x_emb, (1, 0, 2)))
    return jnp.transpose(ys, (1, 0, 2))


# ---------------------------------------------------------------------------
# Deterministic parameter construction (mimics nn.Linear default init)
# ---------------------------------------------------------------------------

def _make_params(key, vocab_size, input_size, hidden_size, output_size):
    concat = input_size + hidden_size
    keys = jax.random.split(key, 12)

    word_embeddings = jax.random.normal(
        keys[0], (vocab_size, input_size), jnp.float32)

    gbound = 1.0 / jnp.sqrt(concat)

    def gate_weight(k):
        # PyTorch Linear weight is (out=H, in=concat); we use its transpose.
        return jax.random.uniform(k, (concat, hidden_size), jnp.float32,
                                  -gbound, gbound)

    def gate_bias(k):
        return jax.random.uniform(k, (hidden_size,), jnp.float32, -gbound, gbound)

    # Gate order: forget, update, output, candidate (must match kernel slicing).
    w_f, w_u, w_o, w_c = (gate_weight(keys[i]) for i in range(1, 5))
    b_f, b_u, b_o, b_c = (gate_bias(keys[i]) for i in range(5, 9))

    # concat order in PyTorch is (a_prev, xt) -> rows [0:H] act on a, [H:] on x.
    H = hidden_size
    w_a = jnp.concatenate([w_f[:H], w_u[:H], w_o[:H], w_c[:H]], axis=1)   # (H, 4H)
    w_x = jnp.concatenate([w_f[H:], w_u[H:], w_o[H:], w_c[H:]], axis=1)   # (D, 4H)
    b_gates = jnp.concatenate([b_f, b_u, b_o, b_c])[None, :]              # (1, 4H)

    pbound = 1.0 / jnp.sqrt(hidden_size)
    w_pred = jax.random.uniform(keys[9], (hidden_size, output_size),
                                jnp.float32, -pbound, pbound)
    b_pred = jax.random.uniform(keys[10], (output_size,),
                                jnp.float32, -pbound, pbound)[None, :]

    return word_embeddings, w_a, w_x, b_gates, w_pred, b_pred


if __name__ == "__main__":
    vocab_size = 50
    input_size = 16     # embedding dim
    hidden_size = 32
    output_size = 8
    batch = 2
    seq = 8

    key = jax.random.PRNGKey(0)
    pkey, tkey = jax.random.split(key)

    params = _make_params(pkey, vocab_size, input_size, hidden_size, output_size)
    tokens = jax.random.randint(tkey, (batch, seq), 0, vocab_size, jnp.int32)

    y = jax.block_until_ready(uni_lstm_forward(tokens, *params))
    y_ref = _ref_forward(tokens, *params)

    assert y.shape == (batch, seq, output_size)
    # Kernel uses bf16 MXU operands with f32 accumulation; compare against the
    # all-f32 reference with a correspondingly relaxed tolerance.
    err = float(jnp.max(jnp.abs(y - y_ref)))
    assert jnp.allclose(y, y_ref, atol=2e-2, rtol=2e-2), (
        f"mismatch vs reference, max abs err = {err}")

    print("KERNEL_OK")
</pallas_src>

<mosaic_0001>
module attributes {stable_mosaic.version = 11 : i64} {
  func.func @_fused_lstm_kernel(%arg0: i32, %arg1: memref<64x16xbf16, #tpu.memory_space<vmem>>, %arg2: memref<16x512xbf16, #tpu.memory_space<vmem>>, %arg3: memref<1x512xf32, #tpu.memory_space<vmem>>, %arg4: memref<128x512xbf16, #tpu.memory_space<any>>, %arg5: memref<128x128xbf16, #tpu.memory_space<vmem>>, %arg6: memref<1x128xf32, #tpu.memory_space<vmem>>, %arg7: memref<8x8x128xf32, #tpu.memory_space<vmem>>, %arg8: memref<128x512xbf16, #tpu.memory_space<vmem>>, %arg9: memref<64x512xf32, #tpu.memory_space<vmem>>, %arg10: memref<8x128xf32, #tpu.memory_space<vmem>>, %arg11: memref<8x128xf32, #tpu.memory_space<vmem>>, %arg12: memref<!tpu.dma_semaphore, #tpu.memory_space<semaphore_mem>>) attributes {dimension_semantics = [#tpu.dimension_semantics<arbitrary>], iteration_bounds = array<i64: 1>, scalar_prefetch = 0 : i64, scratch_operands = 5 : i64, tpu.core_type = #tpu.core_type<tc>, window_params = [{transform_indices = @transform_0, window_bounds = array<i64: 64, 16>}, {pipeline_mode = #tpu.pipeline_mode<synchronous>, transform_indices = @transform_1, window_bounds = array<i64: 16, 512>}, {pipeline_mode = #tpu.pipeline_mode<synchronous>, transform_indices = @transform_2, window_bounds = array<i64: 1, 512>}, {}, {pipeline_mode = #tpu.pipeline_mode<synchronous>, transform_indices = @transform_4, window_bounds = array<i64: 128, 128>}, {pipeline_mode = #tpu.pipeline_mode<synchronous>, transform_indices = @transform_5, window_bounds = array<i64: 1, 128>}, {transform_indices = @transform_6, window_bounds = array<i64: 8, 8, 128>}]} {
    %c0_i32 = arith.constant 0 : i32
    %0 = arith.cmpi eq, %arg0, %c0_i32 : i32
    %1 = arith.extui %0 : i1 to i32
    %c0_i32_0 = arith.constant 0 : i32
    %2 = arith.cmpi ne, %1, %c0_i32_0 : i32
    scf.if %2 {
      %cst_171 = arith.constant 0.000000e+00 : f32
      %399 = vector.broadcast %cst_171 : f32 to vector<8x128xf32>
      %c0_172 = arith.constant 0 : index
      %c0_173 = arith.constant 0 : index
      %400 = vector.load %arg10[%c0_172, %c0_173] : memref<8x128xf32, #tpu.memory_space<vmem>>, vector<8x128xf32>
      tpu.vector_store %arg10[%c0_172, %c0_173], %399 {strides = array<i32>} : memref<8x128xf32, #tpu.memory_space<vmem>>, vector<8x128xf32>,
      %cst_174 = arith.constant 0.000000e+00 : f32
      %401 = vector.broadcast %cst_174 : f32 to vector<8x128xf32>
      %c0_175 = arith.constant 0 : index
      %c0_176 = arith.constant 0 : index
      %402 = vector.load %arg11[%c0_175, %c0_176] : memref<8x128xf32, #tpu.memory_space<vmem>>, vector<8x128xf32>
      tpu.vector_store %arg11[%c0_175, %c0_176], %401 {strides = array<i32>} : memref<8x128xf32, #tpu.memory_space<vmem>>, vector<8x128xf32>,
      tpu.enqueue_dma source(%arg4 : memref<128x512xbf16, #tpu.memory_space<any>>) target(%arg8 : memref<128x512xbf16, #tpu.memory_space<vmem>>) target_semaphore(%arg12 : memref<!tpu.dma_semaphore, #tpu.memory_space<semaphore_mem>>)
      tpu.wait_dma2 semaphore(%arg12 : memref<!tpu.dma_semaphore, #tpu.memory_space<semaphore_mem>>) src(%arg4 : memref<128x512xbf16, #tpu.memory_space<any>>) dst(%arg8 : memref<128x512xbf16, #tpu.memory_space<vmem>>)
    } else {
    }
    %c0 = arith.constant 0 : index
    %c0_1 = arith.constant 0 : index
    %3 = vector.load %arg1[%c0, %c0_1] : memref<64x16xbf16, #tpu.memory_space<vmem>>, vector<64x16xbf16>
    %c0_2 = arith.constant 0 : index
    %c0_3 = arith.constant 0 : index
    %4 = vector.load %arg2[%c0_2, %c0_3] : memref<16x512xbf16, #tpu.memory_space<vmem>>, vector<16x512xbf16>
    %cst = arith.constant dense<0.000000e+00> : vector<64x512xf32>
    %5 = tpu.matmul %3, %4, %cst {dimension_numbers = #tpu.dot_dimension_numbers<[1], [0], [0], [1], [0, 0, 1, 1], [], []>} : vector<64x16xbf16>, vector<16x512xbf16>, vector<64x512xf32> -> vector<64x512xf32>
    %c0_4 = arith.constant 0 : index
    %c0_5 = arith.constant 0 : index
    %6 = vector.load %arg3[%c0_4, %c0_5] : memref<1x512xf32, #tpu.memory_space<vmem>>, vector<1x512xf32>
    %7 = vector.broadcast %6 : vector<1x512xf32> to vector<64x512xf32>
    %8 = arith.addf %5, %7 : vector<64x512xf32>
    %c0_6 = arith.constant 0 : index
    %c0_7 = arith.constant 0 : index
    %9 = vector.load %arg9[%c0_6, %c0_7] : memref<64x512xf32, #tpu.memory_space<vmem>>, vector<64x512xf32>
    tpu.vector_store %arg9[%c0_6, %c0_7], %8 {strides = array<i32>} : memref<64x512xf32, #tpu.memory_space<vmem>>, vector<64x512xf32>,
    %c0_8 = arith.constant 0 : index
    %c0_9 = arith.constant 0 : index
    %10 = vector.load %arg6[%c0_8, %c0_9] : memref<1x128xf32, #tpu.memory_space<vmem>>, vector<1x128xf32>
    %c0_10 = arith.constant 0 : index
    %c0_11 = arith.constant 0 : index
    %11 = vector.load %arg10[%c0_10, %c0_11] : memref<8x128xf32, #tpu.memory_space<vmem>>, vector<8x128xf32>
    %c0_12 = arith.constant 0 : index
    %c0_13 = arith.constant 0 : index
    %12 = vector.load %arg11[%c0_12, %c0_13] : memref<8x128xf32, #tpu.memory_space<vmem>>, vector<8x128xf32>
    %c0_i32_14 = arith.constant 0 : i32
    %c8_i32 = arith.constant 8 : i32
    %13 = arith.muli %c0_i32_14, %c8_i32 : i32
    %14 = tpu.assume_multiple %13, 8 : i32
    %15 = arith.truncf %11 : vector<8x128xf32> to vector<8x128xbf16>
    %c0_15 = arith.constant 0 : index
    %c0_16 = arith.constant 0 : index
    %16 = vector.load %arg8[%c0_15, %c0_16] : memref<128x512xbf16, #tpu.memory_space<vmem>>, vector<128x512xbf16>
    %cst_17 = arith.constant dense<0.000000e+00> : vector<8x512xf32>
    %17 = tpu.matmul %15, %16, %cst_17 {dimension_numbers = #tpu.dot_dimension_numbers<[1], [0], [0], [1], [0, 0, 1, 1], [], []>} : vector<8x128xbf16>, vector<128x512xbf16>, vector<8x512xf32> -> vector<8x512xf32>
    %18 = arith.index_cast %14 : i32 to index
    %c0_18 = arith.constant 0 : index
    %19 = vector.load %arg9[%18, %c0_18] : memref<64x512xf32, #tpu.memory_space<vmem>>, vector<8x512xf32>
    %20 = arith.addf %17, %19 : vector<8x512xf32>
    %21 = vector.extract_strided_slice %20 {offsets = [0, 0], sizes = [8, 128], strides = [1, 1]} : vector<8x512xf32> to vector<8x128xf32>
    %cst_19 = arith.constant 5.000000e-01 : f32
    %22 = vector.broadcast %cst_19 : f32 to vector<8x128xf32>
    %23 = arith.mulf %22, %21 : vector<8x128xf32>
    %24 = math.tanh %23 : vector<8x128xf32>
    %cst_20 = arith.constant 1.000000e+00 : f32
    %25 = vector.broadcast %cst_20 : f32 to vector<8x128xf32>
    %26 = arith.addf %24, %25 : vector<8x128xf32>
    %cst_21 = arith.constant 5.000000e-01 : f32
    %27 = vector.broadcast %cst_21 : f32 to vector<8x128xf32>
    %28 = arith.mulf %27, %26 : vector<8x128xf32>
    %29 = vector.extract_strided_slice %20 {offsets = [0, 128], sizes = [8, 128], strides = [1, 1]} : vector<8x512xf32> to vector<8x128xf32>
    %cst_22 = arith.constant 5.000000e-01 : f32
    %30 = vector.broadcast %cst_22 : f32 to vector<8x128xf32>
    %31 = arith.mulf %30, %29 : vector<8x128xf32>
    %32 = math.tanh %31 : vector<8x128xf32>
    %cst_23 = arith.constant 1.000000e+00 : f32
    %33 = vector.broadcast %cst_23 : f32 to vector<8x128xf32>
    %34 = arith.addf %32, %33 : vector<8x128xf32>
    %cst_24 = arith.constant 5.000000e-01 : f32
    %35 = vector.broadcast %cst_24 : f32 to vector<8x128xf32>
    %36 = arith.mulf %35, %34 : vector<8x128xf32>
    %37 = vector.extract_strided_slice %20 {offsets = [0, 256], sizes = [8, 128], strides = [1, 1]} : vector<8x512xf32> to vector<8x128xf32>
    %cst_25 = arith.constant 5.000000e-01 : f32
    %38 = vector.broadcast %cst_25 : f32 to vector<8x128xf32>
    %39 = arith.mulf %38, %37 : vector<8x128xf32>
    %40 = math.tanh %39 : vector<8x128xf32>
    %cst_26 = arith.constant 1.000000e+00 : f32
    %41 = vector.broadcast %cst_26 : f32 to vector<8x128xf32>
    %42 = arith.addf %40, %41 : vector<8x128xf32>
    %cst_27 = arith.constant 5.000000e-01 : f32
    %43 = vector.broadcast %cst_27 : f32 to vector<8x128xf32>
    %44 = arith.mulf %43, %42 : vector<8x128xf32>
    %45 = vector.extract_strided_slice %20 {offsets = [0, 384], sizes = [8, 128], strides = [1, 1]} : vector<8x512xf32> to vector<8x128xf32>
    %46 = math.tanh %45 : vector<8x128xf32>
    %47 = arith.mulf %28, %12 : vector<8x128xf32>
    %48 = arith.mulf %36, %46 : vector<8x128xf32>
    %49 = arith.addf %47, %48 : vector<8x128xf32>
    %50 = math.tanh %49 : vector<8x128xf32>
    %51 = arith.mulf %44, %50 : vector<8x128xf32>
    %52 = arith.truncf %51 : vector<8x128xf32> to vector<8x128xbf16>
    %c0_28 = arith.constant 0 : index
    %c0_29 = arith.constant 0 : index
    %53 = vector.load %arg5[%c0_28, %c0_29] : memref<128x128xbf16, #tpu.memory_space<vmem>>, vector<128x128xbf16>
    %cst_30 = arith.constant dense<0.000000e+00> : vector<8x128xf32>
    %54 = tpu.matmul %52, %53, %cst_30 {dimension_numbers = #tpu.dot_dimension_numbers<[1], [0], [0], [1], [0, 0, 1, 1], [], []>} : vector<8x128xbf16>, vector<128x128xbf16>, vector<8x128xf32> -> vector<8x128xf32>
    %55 = vector.broadcast %10 : vector<1x128xf32> to vector<8x128xf32>
    %56 = arith.addf %54, %55 : vector<8x128xf32>
    %57 = arith.index_cast %c0_i32_14 : i32 to index
    %c0_31 = arith.constant 0 : index
    %c0_32 = arith.constant 0 : index
    %58 = vector.load %arg7[%57, %c0_31, %c0_32] : memref<8x8x128xf32, #tpu.memory_space<vmem>>, vector<1x8x128xf32>
    %59 = vector.shape_cast %58 : vector<1x8x128xf32> to vector<8x128xf32>
    %60 = vector.shape_cast %56 : vector<8x128xf32> to vector<1x8x128xf32>
    tpu.vector_store %arg7[%57, %c0_31, %c0_32], %60 {strides = array<i32>} : memref<8x8x128xf32, #tpu.memory_space<vmem>>, vector<1x8x128xf32>,
    %c1_i32 = arith.constant 1 : i32
    %c8_i32_33 = arith.constant 8 : i32
    %61 = arith.muli %c1_i32, %c8_i32_33 : i32
    %62 = tpu.assume_multiple %61, 8 : i32
    %63 = arith.truncf %51 : vector<8x128xf32> to vector<8x128xbf16>
    %c0_34 = arith.constant 0 : index
    %c0_35 = arith.constant 0 : index
    %64 = vector.load %arg8[%c0_34, %c0_35] : memref<128x512xbf16, #tpu.memory_space<vmem>>, vector<128x512xbf16>
    %cst_36 = arith.constant dense<0.000000e+00> : vector<8x512xf32>
    %65 = tpu.matmul %63, %64, %cst_36 {dimension_numbers = #tpu.dot_dimension_numbers<[1], [0], [0], [1], [0, 0, 1, 1], [], []>} : vector<8x128xbf16>, vector<128x512xbf16>, vector<8x512xf32> -> vector<8x512xf32>
    %66 = arith.index_cast %62 : i32 to index
    %c0_37 = arith.constant 0 : index
    %67 = vector.load %arg9[%66, %c0_37] : memref<64x512xf32, #tpu.memory_space<vmem>>, vector<8x512xf32>
    %68 = arith.addf %65, %67 : vector<8x512xf32>
    %69 = vector.extract_strided_slice %68 {offsets = [0, 0], sizes = [8, 128], strides = [1, 1]} : vector<8x512xf32> to vector<8x128xf32>
    %cst_38 = arith.constant 5.000000e-01 : f32
    %70 = vector.broadcast %cst_38 : f32 to vector<8x128xf32>
    %71 = arith.mulf %70, %69 : vector<8x128xf32>
    %72 = math.tanh %71 : vector<8x128xf32>
    %cst_39 = arith.constant 1.000000e+00 : f32
    %73 = vector.broadcast %cst_39 : f32 to vector<8x128xf32>
    %74 = arith.addf %72, %73 : vector<8x128xf32>
    %cst_40 = arith.constant 5.000000e-01 : f32
    %75 = vector.broadcast %cst_40 : f32 to vector<8x128xf32>
    %76 = arith.mulf %75, %74 : vector<8x128xf32>
    %77 = vector.extract_strided_slice %68 {offsets = [0, 128], sizes = [8, 128], strides = [1, 1]} : vector<8x512xf32> to vector<8x128xf32>
    %cst_41 = arith.constant 5.000000e-01 : f32
    %78 = vector.broadcast %cst_41 : f32 to vector<8x128xf32>
    %79 = arith.mulf %78, %77 : vector<8x128xf32>
    %80 = math.tanh %79 : vector<8x128xf32>
    %cst_42 = arith.constant 1.000000e+00 : f32
    %81 = vector.broadcast %cst_42 : f32 to vector<8x128xf32>
    %82 = arith.addf %80, %81 : vector<8x128xf32>
    %cst_43 = arith.constant 5.000000e-01 : f32
    %83 = vector.broadcast %cst_43 : f32 to vector<8x128xf32>
    %84 = arith.mulf %83, %82 : vector<8x128xf32>
    %85 = vector.extract_strided_slice %68 {offsets = [0, 256], sizes = [8, 128], strides = [1, 1]} : vector<8x512xf32> to vector<8x128xf32>
    %cst_44 = arith.constant 5.000000e-01 : f32
    %86 = vector.broadcast %cst_44 : f32 to vector<8x128xf32>
    %87 = arith.mulf %86, %85 : vector<8x128xf32>
    %88 = math.tanh %87 : vector<8x128xf32>
    %cst_45 = arith.constant 1.000000e+00 : f32
    %89 = vector.broadcast %cst_45 : f32 to vector<8x128xf32>
    %90 = arith.addf %88, %89 : vector<8x128xf32>
    %cst_46 = arith.constant 5.000000e-01 : f32
    %91 = vector.broadcast %cst_46 : f32 to vector<8x128xf32>
    %92 = arith.mulf %91, %90 : vector<8x128xf32>
    %93 = vector.extract_strided_slice %68 {offsets = [0, 384], sizes = [8, 128], strides = [1, 1]} : vector<8x512xf32> to vector<8x128xf32>
    %94 = math.tanh %93 : vector<8x128xf32>
    %95 = arith.mulf %76, %49 : vector<8x128xf32>
    %96 = arith.mulf %84, %94 : vector<8x128xf32>
    %97 = arith.addf %95, %96 : vector<8x128xf32>
    %98 = math.tanh %97 : vector<8x128xf32>
    %99 = arith.mulf %92, %98 : vector<8x128xf32>
    %100 = arith.truncf %99 : vector<8x128xf32> to vector<8x128xbf16>
    %c0_47 = arith.constant 0 : index
    %c0_48 = arith.constant 0 : index
    %101 = vector.load %arg5[%c0_47, %c0_48] : memref<128x128xbf16, #tpu.memory_space<vmem>>, vector<128x128xbf16>
    %cst_49 = arith.constant dense<0.000000e+00> : vector<8x128xf32>
    %102 = tpu.matmul %100, %101, %cst_49 {dimension_numbers = #tpu.dot_dimension_numbers<[1], [0], [0], [1], [0, 0, 1, 1], [], []>} : vector<8x128xbf16>, vector<128x128xbf16>, vector<8x128xf32> -> vector<8x128xf32>
    %103 = vector.broadcast %10 : vector<1x128xf32> to vector<8x128xf32>
    %104 = arith.addf %102, %103 : vector<8x128xf32>
    %105 = arith.index_cast %c1_i32 : i32 to index
    %c0_50 = arith.constant 0 : index
    %c0_51 = arith.constant 0 : index
    %106 = vector.load %arg7[%105, %c0_50, %c0_51] : memref<8x8x128xf32, #tpu.memory_space<vmem>>, vector<1x8x128xf32>
    %107 = vector.shape_cast %106 : vector<1x8x128xf32> to vector<8x128xf32>
    %108 = vector.shape_cast %104 : vector<8x128xf32> to vector<1x8x128xf32>
    tpu.vector_store %arg7[%105, %c0_50, %c0_51], %108 {strides = array<i32>} : memref<8x8x128xf32, #tpu.memory_space<vmem>>, vector<1x8x128xf32>,
    %c2_i32 = arith.constant 2 : i32
    %c8_i32_52 = arith.constant 8 : i32
    %109 = arith.muli %c2_i32, %c8_i32_52 : i32
    %110 = tpu.assume_multiple %109, 8 : i32
    %111 = arith.truncf %99 : vector<8x128xf32> to vector<8x128xbf16>
    %c0_53 = arith.constant 0 : index
    %c0_54 = arith.constant 0 : index
    %112 = vector.load %arg8[%c0_53, %c0_54] : memref<128x512xbf16, #tpu.memory_space<vmem>>, vector<128x512xbf16>
    %cst_55 = arith.constant dense<0.000000e+00> : vector<8x512xf32>
    %113 = tpu.matmul %111, %112, %cst_55 {dimension_numbers = #tpu.dot_dimension_numbers<[1], [0], [0], [1], [0, 0, 1, 1], [], []>} : vector<8x128xbf16>, vector<128x512xbf16>, vector<8x512xf32> -> vector<8x512xf32>
    %114 = arith.index_cast %110 : i32 to index
    %c0_56 = arith.constant 0 : index
    %115 = vector.load %arg9[%114, %c0_56] : memref<64x512xf32, #tpu.memory_space<vmem>>, vector<8x512xf32>
    %116 = arith.addf %113, %115 : vector<8x512xf32>
    %117 = vector.extract_strided_slice %116 {offsets = [0, 0], sizes = [8, 128], strides = [1, 1]} : vector<8x512xf32> to vector<8x128xf32>
    %cst_57 = arith.constant 5.000000e-01 : f32
    %118 = vector.broadcast %cst_57 : f32 to vector<8x128xf32>
    %119 = arith.mulf %118, %117 : vector<8x128xf32>
    %120 = math.tanh %119 : vector<8x128xf32>
    %cst_58 = arith.constant 1.000000e+00 : f32
    %121 = vector.broadcast %cst_58 : f32 to vector<8x128xf32>
    %122 = arith.addf %120, %121 : vector<8x128xf32>
    %cst_59 = arith.constant 5.000000e-01 : f32
    %123 = vector.broadcast %cst_59 : f32 to vector<8x128xf32>
    %124 = arith.mulf %123, %122 : vector<8x128xf32>
    %125 = vector.extract_strided_slice %116 {offsets = [0, 128], sizes = [8, 128], strides = [1, 1]} : vector<8x512xf32> to vector<8x128xf32>
    %cst_60 = arith.constant 5.000000e-01 : f32
    %126 = vector.broadcast %cst_60 : f32 to vector<8x128xf32>
    %127 = arith.mulf %126, %125 : vector<8x128xf32>
    %128 = math.tanh %127 : vector<8x128xf32>
    %cst_61 = arith.constant 1.000000e+00 : f32
    %129 = vector.broadcast %cst_61 : f32 to vector<8x128xf32>
    %130 = arith.addf %128, %129 : vector<8x128xf32>
    %cst_62 = arith.constant 5.000000e-01 : f32
    %131 = vector.broadcast %cst_62 : f32 to vector<8x128xf32>
    %132 = arith.mulf %131, %130 : vector<8x128xf32>
    %133 = vector.extract_strided_slice %116 {offsets = [0, 256], sizes = [8, 128], strides = [1, 1]} : vector<8x512xf32> to vector<8x128xf32>
    %cst_63 = arith.constant 5.000000e-01 : f32
    %134 = vector.broadcast %cst_63 : f32 to vector<8x128xf32>
    %135 = arith.mulf %134, %133 : vector<8x128xf32>
    %136 = math.tanh %135 : vector<8x128xf32>
    %cst_64 = arith.constant 1.000000e+00 : f32
    %137 = vector.broadcast %cst_64 : f32 to vector<8x128xf32>
    %138 = arith.addf %136, %137 : vector<8x128xf32>
    %cst_65 = arith.constant 5.000000e-01 : f32
    %139 = vector.broadcast %cst_65 : f32 to vector<8x128xf32>
    %140 = arith.mulf %139, %138 : vector<8x128xf32>
    %141 = vector.extract_strided_slice %116 {offsets = [0, 384], sizes = [8, 128], strides = [1, 1]} : vector<8x512xf32> to vector<8x128xf32>
    %142 = math.tanh %141 : vector<8x128xf32>
    %143 = arith.mulf %124, %97 : vector<8x128xf32>
    %144 = arith.mulf %132, %142 : vector<8x128xf32>
    %145 = arith.addf %143, %144 : vector<8x128xf32>
    %146 = math.tanh %145 : vector<8x128xf32>
    %147 = arith.mulf %140, %146 : vector<8x128xf32>
    %148 = arith.truncf %147 : vector<8x128xf32> to vector<8x128xbf16>
    %c0_66 = arith.constant 0 : index
    %c0_67 = arith.constant 0 : index
    %149 = vector.load %arg5[%c0_66, %c0_67] : memref<128x128xbf16, #tpu.memory_space<vmem>>, vector<128x128xbf16>
    %cst_68 = arith.constant dense<0.000000e+00> : vector<8x128xf32>
    %150 = tpu.matmul %148, %149, %cst_68 {dimension_numbers = #tpu.dot_dimension_numbers<[1], [0], [0], [1], [0, 0, 1, 1], [], []>} : vector<8x128xbf16>, vector<128x128xbf16>, vector<8x128xf32> -> vector<8x128xf32>
    %151 = vector.broadcast %10 : vector<1x128xf32> to vector<8x128xf32>
    %152 = arith.addf %150, %151 : vector<8x128xf32>
    %153 = arith.index_cast %c2_i32 : i32 to index
    %c0_69 = arith.constant 0 : index
    %c0_70 = arith.constant 0 : index
    %154 = vector.load %arg7[%153, %c0_69, %c0_70] : memref<8x8x128xf32, #tpu.memory_space<vmem>>, vector<1x8x128xf32>
    %155 = vector.shape_cast %154 : vector<1x8x128xf32> to vector<8x128xf32>
    %156 = vector.shape_cast %152 : vector<8x128xf32> to vector<1x8x128xf32>
    tpu.vector_store %arg7[%153, %c0_69, %c0_70], %156 {strides = array<i32>} : memref<8x8x128xf32, #tpu.memory_space<vmem>>, vector<1x8x128xf32>,
    %c3_i32 = arith.constant 3 : i32
    %c8_i32_71 = arith.constant 8 : i32
    %157 = arith.muli %c3_i32, %c8_i32_71 : i32
    %158 = tpu.assume_multiple %157, 8 : i32
    %159 = arith.truncf %147 : vector<8x128xf32> to vector<8x128xbf16>
    %c0_72 = arith.constant 0 : index
    %c0_73 = arith.constant 0 : index
    %160 = vector.load %arg8[%c0_72, %c0_73] : memref<128x512xbf16, #tpu.memory_space<vmem>>, vector<128x512xbf16>
    %cst_74 = arith.constant dense<0.000000e+00> : vector<8x512xf32>
    %161 = tpu.matmul %159, %160, %cst_74 {dimension_numbers = #tpu.dot_dimension_numbers<[1], [0], [0], [1], [0, 0, 1, 1], [], []>} : vector<8x128xbf16>, vector<128x512xbf16>, vector<8x512xf32> -> vector<8x512xf32>
    %162 = arith.index_cast %158 : i32 to index
    %c0_75 = arith.constant 0 : index
    %163 = vector.load %arg9[%162, %c0_75] : memref<64x512xf32, #tpu.memory_space<vmem>>, vector<8x512xf32>
    %164 = arith.addf %161, %163 : vector<8x512xf32>
    %165 = vector.extract_strided_slice %164 {offsets = [0, 0], sizes = [8, 128], strides = [1, 1]} : vector<8x512xf32> to vector<8x128xf32>
    %cst_76 = arith.constant 5.000000e-01 : f32
    %166 = vector.broadcast %cst_76 : f32 to vector<8x128xf32>
    %167 = arith.mulf %166, %165 : vector<8x128xf32>
    %168 = math.tanh %167 : vector<8x128xf32>
    %cst_77 = arith.constant 1.000000e+00 : f32
    %169 = vector.broadcast %cst_77 : f32 to vector<8x128xf32>
    %170 = arith.addf %168, %169 : vector<8x128xf32>
    %cst_78 = arith.constant 5.000000e-01 : f32
    %171 = vector.broadcast %cst_78 : f32 to vector<8x128xf32>
    %172 = arith.mulf %171, %170 : vector<8x128xf32>
    %173 = vector.extract_strided_slice %164 {offsets = [0, 128], sizes = [8, 128], strides = [1, 1]} : vector<8x512xf32> to vector<8x128xf32>
    %cst_79 = arith.constant 5.000000e-01 : f32
    %174 = vector.broadcast %cst_79 : f32 to vector<8x128xf32>
    %175 = arith.mulf %174, %173 : vector<8x128xf32>
    %176 = math.tanh %175 : vector<8x128xf32>
    %cst_80 = arith.constant 1.000000e+00 : f32
    %177 = vector.broadcast %cst_80 : f32 to vector<8x128xf32>
    %178 = arith.addf %176, %177 : vector<8x128xf32>
    %cst_81 = arith.constant 5.000000e-01 : f32
    %179 = vector.broadcast %cst_81 : f32 to vector<8x128xf32>
    %180 = arith.mulf %179, %178 : vector<8x128xf32>
    %181 = vector.extract_strided_slice %164 {offsets = [0, 256], sizes = [8, 128], strides = [1, 1]} : vector<8x512xf32> to vector<8x128xf32>
    %cst_82 = arith.constant 5.000000e-01 : f32
    %182 = vector.broadcast %cst_82 : f32 to vector<8x128xf32>
    %183 = arith.mulf %182, %181 : vector<8x128xf32>
    %184 = math.tanh %183 : vector<8x128xf32>
    %cst_83 = arith.constant 1.000000e+00 : f32
    %185 = vector.broadcast %cst_83 : f32 to vector<8x128xf32>
    %186 = arith.addf %184, %185 : vector<8x128xf32>
    %cst_84 = arith.constant 5.000000e-01 : f32
    %187 = vector.broadcast %cst_84 : f32 to vector<8x128xf32>
    %188 = arith.mulf %187, %186 : vector<8x128xf32>
    %189 = vector.extract_strided_slice %164 {offsets = [0, 384], sizes = [8, 128], strides = [1, 1]} : vector<8x512xf32> to vector<8x128xf32>
    %190 = math.tanh %189 : vector<8x128xf32>
    %191 = arith.mulf %172, %145 : vector<8x128xf32>
    %192 = arith.mulf %180, %190 : vector<8x128xf32>
    %193 = arith.addf %191, %192 : vector<8x128xf32>
    %194 = math.tanh %193 : vector<8x128xf32>
    %195 = arith.mulf %188, %194 : vector<8x128xf32>
    %196 = arith.truncf %195 : vector<8x128xf32> to vector<8x128xbf16>
    %c0_85 = arith.constant 0 : index
    %c0_86 = arith.constant 0 : index
    %197 = vector.load %arg5[%c0_85, %c0_86] : memref<128x128xbf16, #tpu.memory_space<vmem>>, vector<128x128xbf16>
    %cst_87 = arith.constant dense<0.000000e+00> : vector<8x128xf32>
    %198 = tpu.matmul %196, %197, %cst_87 {dimension_numbers = #tpu.dot_dimension_numbers<[1], [0], [0], [1], [0, 0, 1, 1], [], []>} : vector<8x128xbf16>, vector<128x128xbf16>, vector<8x128xf32> -> vector<8x128xf32>
    %199 = vector.broadcast %10 : vector<1x128xf32> to vector<8x128xf32>
    %200 = arith.addf %198, %199 : vector<8x128xf32>
    %201 = arith.index_cast %c3_i32 : i32 to index
    %c0_88 = arith.constant 0 : index
    %c0_89 = arith.constant 0 : index
    %202 = vector.load %arg7[%201, %c0_88, %c0_89] : memref<8x8x128xf32, #tpu.memory_space<vmem>>, vector<1x8x128xf32>
    %203 = vector.shape_cast %202 : vector<1x8x128xf32> to vector<8x128xf32>
    %204 = vector.shape_cast %200 : vector<8x128xf32> to vector<1x8x128xf32>
    tpu.vector_store %arg7[%201, %c0_88, %c0_89], %204 {strides = array<i32>} : memref<8x8x128xf32, #tpu.memory_space<vmem>>, vector<1x8x128xf32>,
    %c4_i32 = arith.constant 4 : i32
    %c8_i32_90 = arith.constant 8 : i32
    %205 = arith.muli %c4_i32, %c8_i32_90 : i32
    %206 = tpu.assume_multiple %205, 8 : i32
    %207 = arith.truncf %195 : vector<8x128xf32> to vector<8x128xbf16>
    %c0_91 = arith.constant 0 : index
    %c0_92 = arith.constant 0 : index
    %208 = vector.load %arg8[%c0_91, %c0_92] : memref<128x512xbf16, #tpu.memory_space<vmem>>, vector<128x512xbf16>
    %cst_93 = arith.constant dense<0.000000e+00> : vector<8x512xf32>
    %209 = tpu.matmul %207, %208, %cst_93 {dimension_numbers = #tpu.dot_dimension_numbers<[1], [0], [0], [1], [0, 0, 1, 1], [], []>} : vector<8x128xbf16>, vector<128x512xbf16>, vector<8x512xf32> -> vector<8x512xf32>
    %210 = arith.index_cast %206 : i32 to index
    %c0_94 = arith.constant 0 : index
    %211 = vector.load %arg9[%210, %c0_94] : memref<64x512xf32, #tpu.memory_space<vmem>>, vector<8x512xf32>
    %212 = arith.addf %209, %211 : vector<8x512xf32>
    %213 = vector.extract_strided_slice %212 {offsets = [0, 0], sizes = [8, 128], strides = [1, 1]} : vector<8x512xf32> to vector<8x128xf32>
    %cst_95 = arith.constant 5.000000e-01 : f32
    %214 = vector.broadcast %cst_95 : f32 to vector<8x128xf32>
    %215 = arith.mulf %214, %213 : vector<8x128xf32>
    %216 = math.tanh %215 : vector<8x128xf32>
    %cst_96 = arith.constant 1.000000e+00 : f32
    %217 = vector.broadcast %cst_96 : f32 to vector<8x128xf32>
    %218 = arith.addf %216, %217 : vector<8x128xf32>
    %cst_97 = arith.constant 5.000000e-01 : f32
    %219 = vector.broadcast %cst_97 : f32 to vector<8x128xf32>
    %220 = arith.mulf %219, %218 : vector<8x128xf32>
    %221 = vector.extract_strided_slice %212 {offsets = [0, 128], sizes = [8, 128], strides = [1, 1]} : vector<8x512xf32> to vector<8x128xf32>
    %cst_98 = arith.constant 5.000000e-01 : f32
    %222 = vector.broadcast %cst_98 : f32 to vector<8x128xf32>
    %223 = arith.mulf %222, %221 : vector<8x128xf32>
    %224 = math.tanh %223 : vector<8x128xf32>
    %cst_99 = arith.constant 1.000000e+00 : f32
    %225 = vector.broadcast %cst_99 : f32 to vector<8x128xf32>
    %226 = arith.addf %224, %225 : vector<8x128xf32>
    %cst_100 = arith.constant 5.000000e-01 : f32
    %227 = vector.broadcast %cst_100 : f32 to vector<8x128xf32>
    %228 = arith.mulf %227, %226 : vector<8x128xf32>
    %229 = vector.extract_strided_slice %212 {offsets = [0, 256], sizes = [8, 128], strides = [1, 1]} : vector<8x512xf32> to vector<8x128xf32>
    %cst_101 = arith.constant 5.000000e-01 : f32
    %230 = vector.broadcast %cst_101 : f32 to vector<8x128xf32>
    %231 = arith.mulf %230, %229 : vector<8x128xf32>
    %232 = math.tanh %231 : vector<8x128xf32>
    %cst_102 = arith.constant 1.000000e+00 : f32
    %233 = vector.broadcast %cst_102 : f32 to vector<8x128xf32>
    %234 = arith.addf %232, %233 : vector<8x128xf32>
    %cst_103 = arith.constant 5.000000e-01 : f32
    %235 = vector.broadcast %cst_103 : f32 to vector<8x128xf32>
    %236 = arith.mulf %235, %234 : vector<8x128xf32>
    %237 = vector.extract_strided_slice %212 {offsets = [0, 384], sizes = [8, 128], strides = [1, 1]} : vector<8x512xf32> to vector<8x128xf32>
    %238 = math.tanh %237 : vector<8x128xf32>
    %239 = arith.mulf %220, %193 : vector<8x128xf32>
    %240 = arith.mulf %228, %238 : vector<8x128xf32>
    %241 = arith.addf %239, %240 : vector<8x128xf32>
    %242 = math.tanh %241 : vector<8x128xf32>
    %243 = arith.mulf %236, %242 : vector<8x128xf32>
    %244 = arith.truncf %243 : vector<8x128xf32> to vector<8x128xbf16>
    %c0_104 = arith.constant 0 : index
    %c0_105 = arith.constant 0 : index
    %245 = vector.load %arg5[%c0_104, %c0_105] : memref<128x128xbf16, #tpu.memory_space<vmem>>, vector<128x128xbf16>
    %cst_106 = arith.constant dense<0.000000e+00> : vector<8x128xf32>
    %246 = tpu.matmul %244, %245, %cst_106 {dimension_numbers = #tpu.dot_dimension_numbers<[1], [0], [0], [1], [0, 0, 1, 1], [], []>} : vector<8x128xbf16>, vector<128x128xbf16>, vector<8x128xf32> -> vector<8x128xf32>
    %247 = vector.broadcast %10 : vector<1x128xf32> to vector<8x128xf32>
    %248 = arith.addf %246, %247 : vector<8x128xf32>
    %249 = arith.index_cast %c4_i32 : i32 to index
    %c0_107 = arith.constant 0 : index
    %c0_108 = arith.constant 0 : index
    %250 = vector.load %arg7[%249, %c0_107, %c0_108] : memref<8x8x128xf32, #tpu.memory_space<vmem>>, vector<1x8x128xf32>
    %251 = vector.shape_cast %250 : vector<1x8x128xf32> to vector<8x128xf32>
    %252 = vector.shape_cast %248 : vector<8x128xf32> to vector<1x8x128xf32>
    tpu.vector_store %arg7[%249, %c0_107, %c0_108], %252 {strides = array<i32>} : memref<8x8x128xf32, #tpu.memory_space<vmem>>, vector<1x8x128xf32>,
    %c5_i32 = arith.constant 5 : i32
    %c8_i32_109 = arith.constant 8 : i32
    %253 = arith.muli %c5_i32, %c8_i32_109 : i32
    %254 = tpu.assume_multiple %253, 8 : i32
    %255 = arith.truncf %243 : vector<8x128xf32> to vector<8x128xbf16>
    %c0_110 = arith.constant 0 : index
    %c0_111 = arith.constant 0 : index
    %256 = vector.load %arg8[%c0_110, %c0_111] : memref<128x512xbf16, #tpu.memory_space<vmem>>, vector<128x512xbf16>
    %cst_112 = arith.constant dense<0.000000e+00> : vector<8x512xf32>
    %257 = tpu.matmul %255, %256, %cst_112 {dimension_numbers = #tpu.dot_dimension_numbers<[1], [0], [0], [1], [0, 0, 1, 1], [], []>} : vector<8x128xbf16>, vector<128x512xbf16>, vector<8x512xf32> -> vector<8x512xf32>
    %258 = arith.index_cast %254 : i32 to index
    %c0_113 = arith.constant 0 : index
    %259 = vector.load %arg9[%258, %c0_113] : memref<64x512xf32, #tpu.memory_space<vmem>>, vector<8x512xf32>
    %260 = arith.addf %257, %259 : vector<8x512xf32>
    %261 = vector.extract_strided_slice %260 {offsets = [0, 0], sizes = [8, 128], strides = [1, 1]} : vector<8x512xf32> to vector<8x128xf32>
    %cst_114 = arith.constant 5.000000e-01 : f32
    %262 = vector.broadcast %cst_114 : f32 to vector<8x128xf32>
    %263 = arith.mulf %262, %261 : vector<8x128xf32>
    %264 = math.tanh %263 : vector<8x128xf32>
    %cst_115 = arith.constant 1.000000e+00 : f32
    %265 = vector.broadcast %cst_115 : f32 to vector<8x128xf32>
    %266 = arith.addf %264, %265 : vector<8x128xf32>
    %cst_116 = arith.constant 5.000000e-01 : f32
    %267 = vector.broadcast %cst_116 : f32 to vector<8x128xf32>
    %268 = arith.mulf %267, %266 : vector<8x128xf32>
    %269 = vector.extract_strided_slice %260 {offsets = [0, 128], sizes = [8, 128], strides = [1, 1]} : vector<8x512xf32> to vector<8x128xf32>
    %cst_117 = arith.constant 5.000000e-01 : f32
    %270 = vector.broadcast %cst_117 : f32 to vector<8x128xf32>
    %271 = arith.mulf %270, %269 : vector<8x128xf32>
    %272 = math.tanh %271 : vector<8x128xf32>
    %cst_118 = arith.constant 1.000000e+00 : f32
    %273 = vector.broadcast %cst_118 : f32 to vector<8x128xf32>
    %274 = arith.addf %272, %273 : vector<8x128xf32>
    %cst_119 = arith.constant 5.000000e-01 : f32
    %275 = vector.broadcast %cst_119 : f32 to vector<8x128xf32>
    %276 = arith.mulf %275, %274 : vector<8x128xf32>
    %277 = vector.extract_strided_slice %260 {offsets = [0, 256], sizes = [8, 128], strides = [1, 1]} : vector<8x512xf32> to vector<8x128xf32>
    %cst_120 = arith.constant 5.000000e-01 : f32
    %278 = vector.broadcast %cst_120 : f32 to vector<8x128xf32>
    %279 = arith.mulf %278, %277 : vector<8x128xf32>
    %280 = math.tanh %279 : vector<8x128xf32>
    %cst_121 = arith.constant 1.000000e+00 : f32
    %281 = vector.broadcast %cst_121 : f32 to vector<8x128xf32>
    %282 = arith.addf %280, %281 : vector<8x128xf32>
    %cst_122 = arith.constant 5.000000e-01 : f32
    %283 = vector.broadcast %cst_122 : f32 to vector<8x128xf32>
    %284 = arith.mulf %283, %282 : vector<8x128xf32>
    %285 = vector.extract_strided_slice %260 {offsets = [0, 384], sizes = [8, 128], strides = [1, 1]} : vector<8x512xf32> to vector<8x128xf32>
    %286 = math.tanh %285 : vector<8x128xf32>
    %287 = arith.mulf %268, %241 : vector<8x128xf32>
    %288 = arith.mulf %276, %286 : vector<8x128xf32>
    %289 = arith.addf %287, %288 : vector<8x128xf32>
    %290 = math.tanh %289 : vector<8x128xf32>
    %291 = arith.mulf %284, %290 : vector<8x128xf32>
    %292 = arith.truncf %291 : vector<8x128xf32> to vector<8x128xbf16>
    %c0_123 = arith.constant 0 : index
    %c0_124 = arith.constant 0 : index
    %293 = vector.load %arg5[%c0_123, %c0_124] : memref<128x128xbf16, #tpu.memory_space<vmem>>, vector<128x128xbf16>
    %cst_125 = arith.constant dense<0.000000e+00> : vector<8x128xf32>
    %294 = tpu.matmul %292, %293, %cst_125 {dimension_numbers = #tpu.dot_dimension_numbers<[1], [0], [0], [1], [0, 0, 1, 1], [], []>} : vector<8x128xbf16>, vector<128x128xbf16>, vector<8x128xf32> -> vector<8x128xf32>
    %295 = vector.broadcast %10 : vector<1x128xf32> to vector<8x128xf32>
    %296 = arith.addf %294, %295 : vector<8x128xf32>
    %297 = arith.index_cast %c5_i32 : i32 to index
    %c0_126 = arith.constant 0 : index
    %c0_127 = arith.constant 0 : index
    %298 = vector.load %arg7[%297, %c0_126, %c0_127] : memref<8x8x128xf32, #tpu.memory_space<vmem>>, vector<1x8x128xf32>
    %299 = vector.shape_cast %298 : vector<1x8x128xf32> to vector<8x128xf32>
    %300 = vector.shape_cast %296 : vector<8x128xf32> to vector<1x8x128xf32>
    tpu.vector_store %arg7[%297, %c0_126, %c0_127], %300 {strides = array<i32>} : memref<8x8x128xf32, #tpu.memory_space<vmem>>, vector<1x8x128xf32>,
    %c6_i32 = arith.constant 6 : i32
    %c8_i32_128 = arith.constant 8 : i32
    %301 = arith.muli %c6_i32, %c8_i32_128 : i32
    %302 = tpu.assume_multiple %301, 8 : i32
    %303 = arith.truncf %291 : vector<8x128xf32> to vector<8x128xbf16>
    %c0_129 = arith.constant 0 : index
    %c0_130 = arith.constant 0 : index
    %304 = vector.load %arg8[%c0_129, %c0_130] : memref<128x512xbf16, #tpu.memory_space<vmem>>, vector<128x512xbf16>
    %cst_131 = arith.constant dense<0.000000e+00> : vector<8x512xf32>
    %305 = tpu.matmul %303, %304, %cst_131 {dimension_numbers = #tpu.dot_dimension_numbers<[1], [0], [0], [1], [0, 0, 1, 1], [], []>} : vector<8x128xbf16>, vector<128x512xbf16>, vector<8x512xf32> -> vector<8x512xf32>
    %306 = arith.index_cast %302 : i32 to index
    %c0_132 = arith.constant 0 : index
    %307 = vector.load %arg9[%306, %c0_132] : memref<64x512xf32, #tpu.memory_space<vmem>>, vector<8x512xf32>
    %308 = arith.addf %305, %307 : vector<8x512xf32>
    %309 = vector.extract_strided_slice %308 {offsets = [0, 0], sizes = [8, 128], strides = [1, 1]} : vector<8x512xf32> to vector<8x128xf32>
    %cst_133 = arith.constant 5.000000e-01 : f32
    %310 = vector.broadcast %cst_133 : f32 to vector<8x128xf32>
    %311 = arith.mulf %310, %309 : vector<8x128xf32>
    %312 = math.tanh %311 : vector<8x128xf32>
    %cst_134 = arith.constant 1.000000e+00 : f32
    %313 = vector.broadcast %cst_134 : f32 to vector<8x128xf32>
    %314 = arith.addf %312, %313 : vector<8x128xf32>
    %cst_135 = arith.constant 5.000000e-01 : f32
    %315 = vector.broadcast %cst_135 : f32 to vector<8x128xf32>
    %316 = arith.mulf %315, %314 : vector<8x128xf32>
    %317 = vector.extract_strided_slice %308 {offsets = [0, 128], sizes = [8, 128], strides = [1, 1]} : vector<8x512xf32> to vector<8x128xf32>
    %cst_136 = arith.constant 5.000000e-01 : f32
    %318 = vector.broadcast %cst_136 : f32 to vector<8x128xf32>
    %319 = arith.mulf %318, %317 : vector<8x128xf32>
    %320 = math.tanh %319 : vector<8x128xf32>
    %cst_137 = arith.constant 1.000000e+00 : f32
    %321 = vector.broadcast %cst_137 : f32 to vector<8x128xf32>
    %322 = arith.addf %320, %321 : vector<8x128xf32>
    %cst_138 = arith.constant 5.000000e-01 : f32
    %323 = vector.broadcast %cst_138 : f32 to vector<8x128xf32>
    %324 = arith.mulf %323, %322 : vector<8x128xf32>
    %325 = vector.extract_strided_slice %308 {offsets = [0, 256], sizes = [8, 128], strides = [1, 1]} : vector<8x512xf32> to vector<8x128xf32>
    %cst_139 = arith.constant 5.000000e-01 : f32
    %326 = vector.broadcast %cst_139 : f32 to vector<8x128xf32>
    %327 = arith.mulf %326, %325 : vector<8x128xf32>
    %328 = math.tanh %327 : vector<8x128xf32>
    %cst_140 = arith.constant 1.000000e+00 : f32
    %329 = vector.broadcast %cst_140 : f32 to vector<8x128xf32>
    %330 = arith.addf %328, %329 : vector<8x128xf32>
    %cst_141 = arith.constant 5.000000e-01 : f32
    %331 = vector.broadcast %cst_141 : f32 to vector<8x128xf32>
    %332 = arith.mulf %331, %330 : vector<8x128xf32>
    %333 = vector.extract_strided_slice %308 {offsets = [0, 384], sizes = [8, 128], strides = [1, 1]} : vector<8x512xf32> to vector<8x128xf32>
    %334 = math.tanh %333 : vector<8x128xf32>
    %335 = arith.mulf %316, %289 : vector<8x128xf32>
    %336 = arith.mulf %324, %334 : vector<8x128xf32>
    %337 = arith.addf %335, %336 : vector<8x128xf32>
    %338 = math.tanh %337 : vector<8x128xf32>
    %339 = arith.mulf %332, %338 : vector<8x128xf32>
    %340 = arith.truncf %339 : vector<8x128xf32> to vector<8x128xbf16>
    %c0_142 = arith.constant 0 : index
    %c0_143 = arith.constant 0 : index
    %341 = vector.load %arg5[%c0_142, %c0_143] : memref<128x128xbf16, #tpu.memory_space<vmem>>, vector<128x128xbf16>
    %cst_144 = arith.constant dense<0.000000e+00> : vector<8x128xf32>
    %342 = tpu.matmul %340, %341, %cst_144 {dimension_numbers = #tpu.dot_dimension_numbers<[1], [0], [0], [1], [0, 0, 1, 1], [], []>} : vector<8x128xbf16>, vector<128x128xbf16>, vector<8x128xf32> -> vector<8x128xf32>
    %343 = vector.broadcast %10 : vector<1x128xf32> to vector<8x128xf32>
    %344 = arith.addf %342, %343 : vector<8x128xf32>
    %345 = arith.index_cast %c6_i32 : i32 to index
    %c0_145 = arith.constant 0 : index
    %c0_146 = arith.constant 0 : index
    %346 = vector.load %arg7[%345, %c0_145, %c0_146] : memref<8x8x128xf32, #tpu.memory_space<vmem>>, vector<1x8x128xf32>
    %347 = vector.shape_cast %346 : vector<1x8x128xf32> to vector<8x128xf32>
    %348 = vector.shape_cast %344 : vector<8x128xf32> to vector<1x8x128xf32>
    tpu.vector_store %arg7[%345, %c0_145, %c0_146], %348 {strides = array<i32>} : memref<8x8x128xf32, #tpu.memory_space<vmem>>, vector<1x8x128xf32>,
    %c7_i32 = arith.constant 7 : i32
    %c8_i32_147 = arith.constant 8 : i32
    %349 = arith.muli %c7_i32, %c8_i32_147 : i32
    %350 = tpu.assume_multiple %349, 8 : i32
    %351 = arith.truncf %339 : vector<8x128xf32> to vector<8x128xbf16>
    %c0_148 = arith.constant 0 : index
    %c0_149 = arith.constant 0 : index
    %352 = vector.load %arg8[%c0_148, %c0_149] : memref<128x512xbf16, #tpu.memory_space<vmem>>, vector<128x512xbf16>
    %cst_150 = arith.constant dense<0.000000e+00> : vector<8x512xf32>
    %353 = tpu.matmul %351, %352, %cst_150 {dimension_numbers = #tpu.dot_dimension_numbers<[1], [0], [0], [1], [0, 0, 1, 1], [], []>} : vector<8x128xbf16>, vector<128x512xbf16>, vector<8x512xf32> -> vector<8x512xf32>
    %354 = arith.index_cast %350 : i32 to index
    %c0_151 = arith.constant 0 : index
    %355 = vector.load %arg9[%354, %c0_151] : memref<64x512xf32, #tpu.memory_space<vmem>>, vector<8x512xf32>
    %356 = arith.addf %353, %355 : vector<8x512xf32>
    %357 = vector.extract_strided_slice %356 {offsets = [0, 0], sizes = [8, 128], strides = [1, 1]} : vector<8x512xf32> to vector<8x128xf32>
    %cst_152 = arith.constant 5.000000e-01 : f32
    %358 = vector.broadcast %cst_152 : f32 to vector<8x128xf32>
    %359 = arith.mulf %358, %357 : vector<8x128xf32>
    %360 = math.tanh %359 : vector<8x128xf32>
    %cst_153 = arith.constant 1.000000e+00 : f32
    %361 = vector.broadcast %cst_153 : f32 to vector<8x128xf32>
    %362 = arith.addf %360, %361 : vector<8x128xf32>
    %cst_154 = arith.constant 5.000000e-01 : f32
    %363 = vector.broadcast %cst_154 : f32 to vector<8x128xf32>
    %364 = arith.mulf %363, %362 : vector<8x128xf32>
    %365 = vector.extract_strided_slice %356 {offsets = [0, 128], sizes = [8, 128], strides = [1, 1]} : vector<8x512xf32> to vector<8x128xf32>
    %cst_155 = arith.constant 5.000000e-01 : f32
    %366 = vector.broadcast %cst_155 : f32 to vector<8x128xf32>
    %367 = arith.mulf %366, %365 : vector<8x128xf32>
    %368 = math.tanh %367 : vector<8x128xf32>
    %cst_156 = arith.constant 1.000000e+00 : f32
    %369 = vector.broadcast %cst_156 : f32 to vector<8x128xf32>
    %370 = arith.addf %368, %369 : vector<8x128xf32>
    %cst_157 = arith.constant 5.000000e-01 : f32
    %371 = vector.broadcast %cst_157 : f32 to vector<8x128xf32>
    %372 = arith.mulf %371, %370 : vector<8x128xf32>
    %373 = vector.extract_strided_slice %356 {offsets = [0, 256], sizes = [8, 128], strides = [1, 1]} : vector<8x512xf32> to vector<8x128xf32>
    %cst_158 = arith.constant 5.000000e-01 : f32
    %374 = vector.broadcast %cst_158 : f32 to vector<8x128xf32>
    %375 = arith.mulf %374, %373 : vector<8x128xf32>
    %376 = math.tanh %375 : vector<8x128xf32>
    %cst_159 = arith.constant 1.000000e+00 : f32
    %377 = vector.broadcast %cst_159 : f32 to vector<8x128xf32>
    %378 = arith.addf %376, %377 : vector<8x128xf32>
    %cst_160 = arith.constant 5.000000e-01 : f32
    %379 = vector.broadcast %cst_160 : f32 to vector<8x128xf32>
    %380 = arith.mulf %379, %378 : vector<8x128xf32>
    %381 = vector.extract_strided_slice %356 {offsets = [0, 384], sizes = [8, 128], strides = [1, 1]} : vector<8x512xf32> to vector<8x128xf32>
    %382 = math.tanh %381 : vector<8x128xf32>
    %383 = arith.mulf %364, %337 : vector<8x128xf32>
    %384 = arith.mulf %372, %382 : vector<8x128xf32>
    %385 = arith.addf %383, %384 : vector<8x128xf32>
    %386 = math.tanh %385 : vector<8x128xf32>
    %387 = arith.mulf %380, %386 : vector<8x128xf32>
    %388 = arith.truncf %387 : vector<8x128xf32> to vector<8x128xbf16>
    %c0_161 = arith.constant 0 : index
    %c0_162 = arith.constant 0 : index
    %389 = vector.load %arg5[%c0_161, %c0_162] : memref<128x128xbf16, #tpu.memory_space<vmem>>, vector<128x128xbf16>
    %cst_163 = arith.constant dense<0.000000e+00> : vector<8x128xf32>
    %390 = tpu.matmul %388, %389, %cst_163 {dimension_numbers = #tpu.dot_dimension_numbers<[1], [0], [0], [1], [0, 0, 1, 1], [], []>} : vector<8x128xbf16>, vector<128x128xbf16>, vector<8x128xf32> -> vector<8x128xf32>
    %391 = vector.broadcast %10 : vector<1x128xf32> to vector<8x128xf32>
    %392 = arith.addf %390, %391 : vector<8x128xf32>
    %393 = arith.index_cast %c7_i32 : i32 to index
    %c0_164 = arith.constant 0 : index
    %c0_165 = arith.constant 0 : index
    %394 = vector.load %arg7[%393, %c0_164, %c0_165] : memref<8x8x128xf32, #tpu.memory_space<vmem>>, vector<1x8x128xf32>
    %395 = vector.shape_cast %394 : vector<1x8x128xf32> to vector<8x128xf32>
    %396 = vector.shape_cast %392 : vector<8x128xf32> to vector<1x8x128xf32>
    tpu.vector_store %arg7[%393, %c0_164, %c0_165], %396 {strides = array<i32>} : memref<8x8x128xf32, #tpu.memory_space<vmem>>, vector<1x8x128xf32>,
    %c8_i32_166 = arith.constant 8 : i32
    %c0_167 = arith.constant 0 : index
    %c0_168 = arith.constant 0 : index
    %397 = vector.load %arg10[%c0_167, %c0_168] : memref<8x128xf32, #tpu.memory_space<vmem>>, vector<8x128xf32>
    tpu.vector_store %arg10[%c0_167, %c0_168], %387 {strides = array<i32>} : memref<8x128xf32, #tpu.memory_space<vmem>>, vector<8x128xf32>,
    %c0_169 = arith.constant 0 : index
    %c0_170 = arith.constant 0 : index
    %398 = vector.load %arg11[%c0_169, %c0_170] : memref<8x128xf32, #tpu.memory_space<vmem>>, vector<8x128xf32>
    tpu.vector_store %arg11[%c0_169, %c0_170], %385 {strides = array<i32>} : memref<8x128xf32, #tpu.memory_space<vmem>>, vector<8x128xf32>,
    return
  }
  func.func @transform_0(%arg0: i32) -> (i32, i32) {
    %c0_i32 = arith.constant 0 : i32
    %c0_i32_0 = arith.constant 0 : i32
    return %arg0, %c0_i32 : i32, i32
  }
  func.func @transform_1(%arg0: i32) -> (i32, i32) {
    %c0_i32 = arith.constant 0 : i32
    %c0_i32_0 = arith.constant 0 : i32
    %c0_i32_1 = arith.constant 0 : i32
    return %c0_i32, %c0_i32_0 : i32, i32
  }
  func.func @transform_2(%arg0: i32) -> (i32, i32) {
    %c0_i32 = arith.constant 0 : i32
    %c0_i32_0 = arith.constant 0 : i32
    %c0_i32_1 = arith.constant 0 : i32
    return %c0_i32, %c0_i32_0 : i32, i32
  }
  func.func @transform_4(%arg0: i32) -> (i32, i32) {
    %c0_i32 = arith.constant 0 : i32
    %c0_i32_0 = arith.constant 0 : i32
    %c0_i32_1 = arith.constant 0 : i32
    return %c0_i32, %c0_i32_0 : i32, i32
  }
  func.func @transform_5(%arg0: i32) -> (i32, i32) {
    %c0_i32 = arith.constant 0 : i32
    %c0_i32_0 = arith.constant 0 : i32
    %c0_i32_1 = arith.constant 0 : i32
    return %c0_i32, %c0_i32_0 : i32, i32
  }
  func.func @transform_6(%arg0: i32) -> (i32, i32, i32) {
    %c0_i32 = arith.constant 0 : i32
    %c0_i32_0 = arith.constant 0 : i32
    %c0_i32_1 = arith.constant 0 : i32
    return %arg0, %c0_i32, %c0_i32_0 : i32, i32, i32
  }
}

</mosaic_0001>

<bundles_post_ra>
// kernel: tpu_custom_call.1
= control target key start
LH: loop header
LB: loop body
LE: loop exit
PB: predicated region body
PF: predicated region fallthrough
CT: control target
= control target key end

     0   :  { %11 = vsyncpa [#allocation8], 0  ;;  %s5362_s0 = inlined_call_operand.vmem [shape: bf16[64,16], index: 0, kind: input, shape index: {}]   ;;  %s5363_s1 = inlined_call_operand.vmem [shape: bf16[16,512], index: 1, kind: input, shape index: {}]   ;;  %s5364_s2 = inlined_call_operand.vmem [shape: f32[1,512], index: 2, kind: input, shape index: {}]   ;;  %s5365_s3 = inlined_call_operand.hbm [shape: bf16[128,512], index: 3, kind: input, shape index: {}]   ;;  %s5366_s4 = inlined_call_operand.hbm [shape: bf16[128,128], index: 4, kind: input, shape index: {}]   ;;  %s5367_s5 = inlined_call_operand.vmem [shape: f32[1,128], index: 5, kind: input, shape index: {}]   ;;  %s5368_s6 = inlined_call_operand.hbm [shape: f32[8,8,128], index: 6, kind: output, shape index: {}]  }
   0x1   :  { %12 = vsyncpa [#allocation9], 0  ;;  %s4569_s21 = smov [#allocation7]  }
   0x2   :  { %s24_s22 = sshll.u32 %s4569_s21, 4  ;;  %s25_s22 = int_to_ptr.vmem [resolvable:$true] %s24_s22 }
   0x3   :  { %s4511_s23 = scalar_lea.vmem %s25_s22, 1024  ;;  %p4516_p1 = scmp.lt.s32.totalorder %s25_s22, %s25_s22 }
   0x4   :  { %p4512_p0 = scmp.ne.s32.totalorder %s25_s22, %s4511_s23  ;;  %p4517_p2 = scmp.lt.s32.totalorder %s4511_s23, %s4511_s23 }
   0x6   :  { %p4518_p3 = por %p4517_p2, %p4516_p1 }
   0x8   :  { %p4519_p4 = pnand %p4518_p3, %p4512_p0 }
   0xa   :  { %4522 = shalt.err (!%p4519_p4)
}
   0xb   :  { %s4570_s24 = smov 64   ;;  %s4571_s25 = smov 4  }
   0xc   :  { %30 = dma.hbm_to_vmem [thread:$0]  %s5366_s4, 1024, %s25_s22, [#allocation8], %s4570_s24, %s4570_s24, %s4571_s25  }
   0xd   :  { %4563 = dma.done.wait [#allocation8], 1024  }
   0xe   :  { %4564 = vsyncadd [#allocation8], 4294966272  ;;  %s4572_s28 = smov [#allocation2]  }
   0xf   :  { %s50_s29 = sshll.u32 %s4572_s28, 4  ;;  %s51_s29 = int_to_ptr.vmem [resolvable:$true] %s50_s29 }
  0x10   :  { %s4531_s30 = scalar_lea.vmem %s51_s29, 4096  ;;  %p4536_p6 = scmp.lt.s32.totalorder %s51_s29, %s51_s29 }
  0x11   :  { %p4532_p5 = scmp.ne.s32.totalorder %s51_s29, %s4531_s30  ;;  %p4537_p7 = scmp.lt.s32.totalorder %s4531_s30, %s4531_s30 }
  0x13   :  { %p4538_p8 = por %p4537_p7, %p4536_p6 }
  0x15   :  { %p4539_p9 = pnand %p4538_p8, %p4532_p5 }
  0x17   :  { %4542 = shalt.err (!%p4539_p9)  }
  0x18   :  { %53 = dma.hbm_to_vmem [thread:$0]  %s5365_s3, 4096, %s51_s29, [#allocation6] }
  0x19   :  { %4565 = dma.done.wait [#allocation6], 4096 }
  0x1a   :  { %4566 = vsyncadd [#allocation6], 4294963200  ;;  %v5371_v0 = vmov 0   ;;  %v4193_v1 = vld [vmem:[%s5363_s1 + $0x4] ss:$16 sps:$4 sm:$0xff]   ;;  %vm132_vm0 = vcmask 130048   ;;  %v72_v51 = vlaneseq }
  0x1b   :  { %177 = vmatprep.mubr.bf16.mxu0 %v5371_v0  ;;  %250 = vmatprep.mubr.bf16.mxu1 %v5371_v0  ;;  %v4195_v2 = vld [vmem:[%s5363_s1 + $0xc] ss:$16 sps:$4 sm:$0xff]   ;;  %v4197_v3 = vld [vmem:[%s5363_s1] ss:$16 sps:$4 sm:$0xff]   ;;  %v4198_v4 = vld [vmem:[%s5363_s1 + $0x8] ss:$16 sps:$4 sm:$0xff]  }
  0x1c   :  { %159 = vmatprep.subr.bf16.mxu0 %v4193_v1  ;;  %232 = vmatprep.subr.bf16.mxu1 %v4195_v2  ;;  %v4199_v5 = vld [vmem:[%s5362_s0] sm:$0xff]   ;;  %v4642_v8 = vld [vmem:[#allocation2 + $0xe8] ss:$16 sps:$4 sm:$0xff]   ;;  %v4645_v9 = vld [vmem:[#allocation2 + $0xec] ss:$16 sps:$4 sm:$0xff]   ;;  %v4574_v41 = vmov 0.0|0.0  }
  0x1d   :  { %160 = vmatpush1.bf16.msra.mxu0 %v4197_v3  ;;  %233 = vmatpush1.bf16.msra.mxu1 %v4198_v4  ;;  %v4638_v6 = vld [vmem:[#allocation2 + $0xe0] ss:$16 sps:$4 sm:$0xff]   ;;  %v4640_v7 = vld [vmem:[#allocation2 + $0xe4] ss:$16 sps:$4 sm:$0xff]   ;;  %v4655_v12 = vld [vmem:[#allocation2 + $0xcc] ss:$16 sps:$4 sm:$0xff]  }
  0x1e   :  { %526 = vmatprep.subr.bf16.mxu0 %v4640_v7  ;;  %v4649_v10 = vld [vmem:[#allocation2 + $0xc4] ss:$16 sps:$4 sm:$0xff]   ;;  %567 = vmatprep.subr.bf16.mxu1 %v4645_v9  ;;  %v4653_v11 = vld [vmem:[#allocation2 + $0xc0] ss:$16 sps:$4 sm:$0xff]   ;;  %v4659_v13 = vld [vmem:[#allocation2 + $0xc8] ss:$16 sps:$4 sm:$0xff]  }
  0x1f   :  { %v4212_v14 = vld [vmem:[%s5362_s0 + $0x8] sm:$0xff]   ;;  %v4667_v15 = vld [vmem:[#allocation2 + $0xa4] ss:$16 sps:$4 sm:$0xff]   ;;  %v4670_v16 = vld [vmem:[#allocation2 + $0xa0] ss:$16 sps:$4 sm:$0xff]   ;;  %v5369_v43 = vmov 0.0  }
  0x20   :  { %3620 = vmatmul.mubr.msk.bf16.vlgmr.msra.gmra.mxu0 %vm132_vm0, %v4199_v5  ;;  %3624 = vmatmul.mubr.msk.bf16.vlgmr.msra.gmra.mxu1 %vm132_vm0, %v4199_v5  ;;  %v4672_v17 = vld [vmem:[#allocation2 + $0xac] ss:$16 sps:$4 sm:$0xff]   ;;  %v4676_v18 = vld [vmem:[#allocation2 + $0xa8] ss:$16 sps:$4 sm:$0xff]   ;;  %v4678_v19 = vld [vmem:[#allocation2 + $0x84] ss:$16 sps:$4 sm:$0xff]  }
  0x21   :  { %527 = vmatpush1.bf16.msra.mxu0 %v4638_v6  ;;  %568 = vmatpush1.bf16.msra.mxu1 %v4642_v8  ;;  %v4683_v20 = vld [vmem:[#allocation2 + $0x8c] ss:$16 sps:$4 sm:$0xff]   ;;  %v4686_v21 = vld [vmem:[#allocation2 + $0x80] ss:$16 sps:$4 sm:$0xff]   ;;  %v4691_v22 = vld [vmem:[#allocation2 + $0x88] ss:$16 sps:$4 sm:$0xff]  }
  0x22   :  { %528 = vmatprep.subr.bf16.mxu0 %v4649_v10  ;;  %569 = vmatprep.subr.bf16.mxu1 %v4655_v12  ;;  %v4693_v23 = vld [vmem:[#allocation2 + $0x64] ss:$16 sps:$4 sm:$0xff]   ;;  %v4697_v24 = vld [vmem:[#allocation2 + $0x6c] ss:$16 sps:$4 sm:$0xff]   ;;  %v4703_v26 = vld [vmem:[#allocation2 + $0x60] ss:$16 sps:$4 sm:$0xff]  }
  0x23   :  { %187 = vmatprep.mubr.bf16.mxu0 %v5371_v0  ;;  %260 = vmatprep.mubr.bf16.mxu1 %v5371_v0  ;;  %v4225_v25 = vld [vmem:[%s5362_s0 + $0x10] sm:$0xff]   ;;  %v4707_v27 = vld [vmem:[#allocation2 + $0x68] ss:$16 sps:$4 sm:$0xff]   ;;  %v4712_v29 = vld [vmem:[#allocation2 + $0x4c] ss:$16 sps:$4 sm:$0xff]   ;;  %vm4576_vm1 = vmmov 0  }
  0x24   :  { %v4709_v28 = vld [vmem:[#allocation2 + $0x44] ss:$16 sps:$4 sm:$0xff]   ;;  %v4716_v30 = vld [vmem:[#allocation2 + $0x40] ss:$16 sps:$4 sm:$0xff]   ;;  %v4719_v31 = vld [vmem:[#allocation2 + $0x48] ss:$16 sps:$4 sm:$0xff]  }
  0x25   :  { %529 = vmatpush1.bf16.msra.mxu0 %v4653_v11  ;;  %570 = vmatpush1.bf16.msra.mxu1 %v4659_v13  ;;  %v4238_v32 = vld [vmem:[%s5362_s0 + $0x18] sm:$0xff]   ;;  %v4727_v33 = vld [vmem:[#allocation2 + $0x24] ss:$16 sps:$4 sm:$0xff]   ;;  %v4731_v34 = vld [vmem:[#allocation2 + $0x20] ss:$16 sps:$4 sm:$0xff]   ;;  %v73_v52 = vshrl.u32 %v72_v51, 7 }
  0x26   :  { %530 = vmatprep.subr.bf16.mxu0 %v4667_v15  ;;  %571 = vmatprep.subr.bf16.mxu1 %v4672_v17  ;;  %v4733_v35 = vld [vmem:[#allocation2 + $0x2c] ss:$16 sps:$4 sm:$0xff]   ;;  %v4735_v36 = vld [vmem:[#allocation2 + $0x28] ss:$16 sps:$4 sm:$0xff]   ;;  %v4737_v37 = vld [vmem:[#allocation2 + $0x4] ss:$16 sps:$4 sm:$0xff]  }
  0x27   :  { %v4740_v38 = vld [vmem:[#allocation2 + $0xc] ss:$16 sps:$4 sm:$0xff]   ;;  %v4745_v39 = vld [vmem:[#allocation2] ss:$16 sps:$4 sm:$0xff]   ;;  %v4749_v40 = vld [vmem:[#allocation2 + $0x8] ss:$16 sps:$4 sm:$0xff]  }
  0x28   :  { %3621 = vmatmul.mubr.msk.bf16.gmra.mxu0 %vm132_vm0, %v4212_v14  ;;  %3625 = vmatmul.mubr.msk.bf16.gmra.mxu1 %vm132_vm0, %v4212_v14  ;;  %v4251_v42 = vld [vmem:[#allocation7 + $0x38] sm:$0xff]   ;;  %v4252_v44 = vld [vmem:[#allocation7 + $0x30] sm:$0xff]   ;;  %v4253_v45 = vld [vmem:[#allocation7 + $0x28] sm:$0xff]   ;;  %v82_v53 = vsub.s32 2, %v73_v52  ;;  %v74_v54 = vsub.s32 0, %v73_v52  ;;  %v86_v55 = vsub.s32 3, %v73_v52 }
  0x29   :  { %531 = vmatpush1.bf16.msra.mxu0 %v4670_v16  ;;  %197 = vmatprep.mubr.bf16.mxu0 %v5371_v0  ;;  %v4254_v46 = vld [vmem:[#allocation7 + $0x20] sm:$0xff]   ;;  %v4255_v47 = vld [vmem:[#allocation7 + $0x18] sm:$0xff]   ;;  %v4256_v48 = vld [vmem:[#allocation7 + $0x10] sm:$0xff]   ;;  %v78_v60 = vsub.s32 1, %v73_v52 }
  0x2a   :  { %572 = vmatpush1.bf16.msra.mxu1 %v4676_v18  ;;  %532 = vmatprep.subr.bf16.mxu0 %v4678_v19  ;;  %v4257_v49 = vld [vmem:[#allocation7 + $0x8] sm:$0xff]   ;;  %v4258_v50 = vld [vmem:[#allocation7] sm:$0xff]  }
  0x2b   :  { %573 = vmatprep.subr.bf16.mxu1 %v4683_v20  ;;  %270 = vmatprep.mubr.bf16.mxu1 %v5371_v0  ;;  %v70_v56 = vld [vmem:[%s5364_s2] sm:$0xf] }
  0x2c   :  { %v4795_v59 = vrot.slane %v70_v56, %v82_v53  ;;  %v75_v63 = vrot.slane %v70_v56, %v74_v54  ;;  %v4801_v1 = vrot.slane %v70_v56, %v86_v55  ;;  %v79_v4 = vrot.slane %v70_v56, %v78_v60 }
  0x2d   :  { %533 = vmatpush1.bf16.msra.mxu0 %v4686_v21 }
  0x2e   :  { %574 = vmatpush1.bf16.msra.mxu1 %v4691_v22  ;;  %534 = vmatprep.subr.bf16.mxu0 %v4693_v23 }
  0x2f   :  { %575 = vmatprep.subr.bf16.mxu1 %v4697_v24 }
  0x30   :  { %3622 = vmatmul.mubr.msk.bf16.gmra.mxu0 %vm132_vm0, %v4225_v25  ;;  %3626 = vmatmul.mubr.msk.bf16.gmra.mxu1 %vm132_vm0, %v4225_v25 }
  0x31   :  { %535 = vmatpush1.bf16.msra.mxu0 %v4703_v26  ;;  %207 = vmatprep.mubr.bf16.mxu0 %v5371_v0 }
  0x32   :  { %576 = vmatpush1.bf16.msra.mxu1 %v4707_v27  ;;  %536 = vmatprep.subr.bf16.mxu0 %v4709_v28 }
  0x33   :  { %577 = vmatprep.subr.bf16.mxu1 %v4712_v29  ;;  %280 = vmatprep.mubr.bf16.mxu1 %v5371_v0 }
  0x35   :  { %537 = vmatpush1.bf16.msra.mxu0 %v4716_v30 }
  0x36   :  { %578 = vmatpush1.bf16.msra.mxu1 %v4719_v31  ;;  %538 = vmatprep.subr.bf16.mxu0 %v4727_v33 }
  0x37   :  { %579 = vmatprep.subr.bf16.mxu1 %v4733_v35 }
  0x38   :  { %3623 = vmatmul.mubr.msk.bf16.gmra.mxu0 %vm132_vm0, %v4238_v32  ;;  %3627 = vmatmul.mubr.msk.bf16.gmra.mxu1 %vm132_vm0, %v4238_v32 }
  0x39   :  { %539 = vmatpush1.bf16.msra.mxu0 %v4731_v34  ;;  %558 = vmatprep.mubr.bf16.mxu0 %v5371_v0 }
  0x3a   :  { %580 = vmatpush1.bf16.msra.mxu1 %v4735_v36  ;;  %540 = vmatprep.subr.bf16.mxu0 %v4737_v37 }
  0x3b   :  { %581 = vmatprep.subr.bf16.mxu1 %v4740_v38  ;;  %599 = vmatprep.mubr.bf16.mxu1 %v5371_v0 }
  0x3d   :  { %541 = vmatpush1.bf16.msra.mxu0 %v4745_v39 }
  0x3e   :  { %582 = vmatpush1.bf16.msra.mxu1 %v4749_v40  ;;  %4022 = vmatprep.subr.bf16.mxu0 %v5369_v43 }
  0x3f   :  { %937 = vmatprep.subr.bf16.mxu1 %v4640_v7 }
  0x40   :  { %559 = vmatmul.mubr.bf16.vlgmr.msra.gmra.mxu0 %v4574_v41 }
  0x41   :  { %600 = vmatmul.mubr.bf16.vlgmr.msra.gmra.mxu1 %v4574_v41  ;;  %4023 = vmatpush3.bf16.msra.mxu0 %v4251_v42 }
  0x42   :  { %938 = vmatpush1.bf16.msra.mxu1 %v4638_v6  ;;  %969 = vmatprep.mubr.bf16.mxu1 %v5371_v0 }
  0x43   :  { %939 = vmatprep.subr.bf16.mxu1 %v4649_v10  ;;  %4024 = vmatprep.subr.bf16.mxu0 %v5369_v43 }
  0x44   :  { %4038 = vmatprep.mubr.msk.bf16.mxu0 %vm4576_vm1, %v5369_v43 }
  0x45   :  { %4025 = vmatpush3.bf16.msra.mxu0 %v4252_v44 }
  0x46   :  { %940 = vmatpush1.bf16.msra.mxu1 %v4653_v11  ;;  %4026 = vmatprep.subr.bf16.mxu0 %v5369_v43 }
  0x47   :  { %941 = vmatprep.subr.bf16.mxu1 %v4667_v15 }
  0x49   :  { %4027 = vmatpush3.bf16.msra.mxu0 %v4253_v45 }
  0x4a   :  { %942 = vmatpush1.bf16.msra.mxu1 %v4670_v16  ;;  %4028 = vmatprep.subr.bf16.mxu0 %v5369_v43 }
  0x4b   :  { %943 = vmatprep.subr.bf16.mxu1 %v4678_v19 }
  0x4d   :  { %4029 = vmatpush3.bf16.msra.mxu0 %v4254_v46 }
  0x4e   :  { %944 = vmatpush1.bf16.msra.mxu1 %v4686_v21  ;;  %4030 = vmatprep.subr.bf16.mxu0 %v5369_v43 }
  0x4f   :  { %945 = vmatprep.subr.bf16.mxu1 %v4693_v23 }
  0x51   :  { %4031 = vmatpush3.bf16.msra.mxu0 %v4255_v47 }
  0x52   :  { %946 = vmatpush1.bf16.msra.mxu1 %v4703_v26  ;;  %4032 = vmatprep.subr.bf16.mxu0 %v5369_v43 }
  0x53   :  { %947 = vmatprep.subr.bf16.mxu1 %v4709_v28 }
  0x55   :  { %4033 = vmatpush3.bf16.msra.mxu0 %v4256_v48 }
  0x56   :  { %948 = vmatpush1.bf16.msra.mxu1 %v4716_v30  ;;  %4034 = vmatprep.subr.bf16.mxu0 %v5369_v43 }
  0x57   :  { %949 = vmatprep.subr.bf16.mxu1 %v4727_v33 }
  0x59   :  { %4035 = vmatpush3.bf16.msra.mxu0 %v4257_v49 }
  0x5a   :  { %950 = vmatpush1.bf16.msra.mxu1 %v4731_v34  ;;  %4036 = vmatprep.subr.bf16.mxu0 %v5369_v43 }
  0x5b   :  { %951 = vmatprep.subr.bf16.mxu1 %v4737_v37 }
  0x5d   :  { %4037 = vmatpush3.bf16.msra.mxu0 %v4258_v50 }
  0x5e   :  { %952 = vmatpush1.bf16.msra.mxu1 %v4745_v39  ;;  %978 = vmatprep.subr.bf16.mxu0 %v4645_v9 }
  0x5f   :  { %4042 = vmatprep.subr.bf16.mxu1 %v5369_v43 }
  0xe0   :  { %v4791_v57 = vpop.f32.mrf.mxu0  ;;  %v4793_v58 = vpop.f32.mrf.mxu1 }
  0xe2   :  { %v4797_v61 = vpop.f32.mrf.mxu0  ;;  %v4799_v62 = vpop.f32.mrf.mxu1 }
  0xe4   :  { %v183_v2 = vpop.f32.mrf.mxu0  ;;  %v256_v3 = vpop.f32.mrf.mxu1 }
  0xe5   :  { %v4803_v5 = vadd.f32 %v183_v2, %v75_v63  ;;  %v4806_v9 = vadd.f32 %v256_v3, %v4795_v59 }
  0xe6   :  { %v185_v14 = vpop.f32.mrf.mxu0  ;;  %v258_v25 = vpop.f32.mrf.mxu1 }
  0xe7   :  { %v4808_v32 = vadd.f32 %v185_v14, %v79_v4  ;;  %v4811_v41 = vadd.f32 %v258_v25, %v4801_v1 }
  0xe8   :  { %v189_v42 = vpop.f32.mrf.mxu0  ;;  %v262_v44 = vpop.f32.mrf.mxu1 }
  0xe9   :  { %v4813_v45 = vadd.f32 %v189_v42, %v75_v63  ;;  %v4816_v46 = vadd.f32 %v262_v44, %v4795_v59 }
  0xea   :  { %v191_v47 = vpop.f32.mrf.mxu0  ;;  %v264_v48 = vpop.f32.mrf.mxu1 }
  0xeb   :  { %v4818_v49 = vadd.f32 %v191_v47, %v79_v4  ;;  %v4821_v50 = vadd.f32 %v264_v48, %v4801_v1 }
  0xec   :  { %v193_v51 = vpop.f32.mrf.mxu0  ;;  %v266_v52 = vpop.f32.mrf.mxu1 }
  0xed   :  { %v4823_v53 = vadd.f32 %v193_v51, %v75_v63  ;;  %v4826_v54 = vadd.f32 %v266_v52, %v4795_v59 }
  0xee   :  { %v195_v55 = vpop.f32.mrf.mxu0  ;;  %v268_v56 = vpop.f32.mrf.mxu1 }
  0xef   :  { %5373 = vst [vmem:[#allocation18_spill] sm:$0xff] %v4826_v54  ;;  %v4828_v60 = vadd.f32 %v195_v55, %v79_v4  ;;  %v4831_v2 = vadd.f32 %v268_v56, %v4801_v1 }
  0xf0   :  { %v199_v3 = vpop.f32.mrf.mxu0  ;;  %v272_v14 = vpop.f32.mrf.mxu1 }
  0xf1   :  { %5374 = vst [vmem:[#allocation19_spill] sm:$0xff] %v4831_v2  ;;  %v4833_v25 = vadd.f32 %v199_v3, %v75_v63  ;;  %v4836_v42 = vadd.f32 %v272_v14, %v4795_v59 }
  0xf2   :  { %v201_v44 = vpop.f32.mrf.mxu0  ;;  %v274_v47 = vpop.f32.mrf.mxu1 }
  0xf3   :  { %5375 = vst [vmem:[#allocation20_spill] sm:$0xff] %v4833_v25  ;;  %5376 = vst [vmem:[#allocation21_spill] sm:$0xff] %v4836_v42  ;;  %v4838_v48 = vadd.f32 %v201_v44, %v79_v4  ;;  %v4841_v51 = vadd.f32 %v274_v47, %v4801_v1 }
  0xf4   :  { %v203_v52 = vpop.f32.mrf.mxu0  ;;  %v276_v55 = vpop.f32.mrf.mxu1 }
  0xf5   :  { %5377 = vst [vmem:[#allocation22_spill] sm:$0xff] %v4838_v48  ;;  %5378 = vst [vmem:[#allocation23_spill] sm:$0xff] %v4841_v51  ;;  %v4843_v43 = vadd.f32 %v203_v52, %v75_v63  ;;  %v4846_v56 = vadd.f32 %v276_v55, %v4795_v59 }
  0xf6   :  { %v205_v0 = vpop.f32.mrf.mxu0  ;;  %v278_v3 = vpop.f32.mrf.mxu1 }
  0xf7   :  { %5379 = vst [vmem:[#allocation24_spill] sm:$0xff] %v4843_v43  ;;  %5380 = vst [vmem:[#allocation25_spill] sm:$0xff] %v4846_v56  ;;  %v4848_v25 = vadd.f32 %v205_v0, %v79_v4  ;;  %v4851_v14 = vadd.f32 %v278_v3, %v4801_v1 }
  0xf8   :  { %v209_v42 = vpop.f32.mrf.mxu0  ;;  %v282_v44 = vpop.f32.mrf.mxu1 }
  0xf9   :  { %5381 = vst [vmem:[#allocation26_spill] sm:$0xff] %v4848_v25  ;;  %5382 = vst [vmem:[#allocation27_spill] sm:$0xff] %v4851_v14  ;;  %v4853_v48 = vadd.f32 %v209_v42, %v75_v63  ;;  %v4856_v47 = vadd.f32 %v282_v44, %v4795_v59 }
  0xfa   :  { %v211_v51 = vpop.f32.mrf.mxu0  ;;  %v284_v52 = vpop.f32.mrf.mxu1 }
  0xfb   :  { %5383 = vst [vmem:[#allocation28_spill] sm:$0xff] %v4853_v48  ;;  %5384 = vst [vmem:[#allocation29_spill] sm:$0xff] %v4856_v47  ;;  %v4858_v43 = vadd.f32 %v211_v51, %v79_v4  ;;  %v4861_v55 = vadd.f32 %v284_v52, %v4801_v1  ;;  %v180_v48 = vadd.f32 %v4791_v57, %v75_v63 }
  0xfc   :  { %v213_v56 = vpop.f32.mrf.mxu0  ;;  %v286_v0 = vpop.f32.mrf.mxu1  ;;  %v182_v52 = vadd.f32 %v4797_v61, %v79_v4  ;;  %v253_v61 = vadd.f32 %v4793_v58, %v4795_v59 }
  0xfd   :  { %5385 = vst [vmem:[#allocation30_spill] sm:$0xff] %v4858_v43  ;;  %5386 = vst [vmem:[#allocation31_spill] sm:$0xff] %v4861_v55  ;;  %v4863_v25 = vadd.f32 %v213_v56, %v75_v63  ;;  %v4866_v3 = vadd.f32 %v286_v0, %v4795_v59 }
  0xfe   :  { %v215_v14 = vpop.f32.mrf.mxu0  ;;  %v288_v42 = vpop.f32.mrf.mxu1 }
  0xff   :  { %5387 = vst [vmem:[#allocation32_spill] sm:$0xff] %v4863_v25  ;;  %5388 = vst [vmem:[#allocation33_spill] sm:$0xff] %v4866_v3  ;;  %v4869_v44 = vadd.f32 %v215_v14, %v79_v4  ;;  %v4872_v47 = vadd.f32 %v288_v42, %v4801_v1  ;;  %v255_v3 = vadd.f32 %v4799_v62, %v4801_v1 }
 0x100   :  { %v560_v51 = vpop.f32.mrf.mxu0 }
 0x101   :  { %5389 = vst [vmem:[#allocation34_spill] sm:$0xff] %v4872_v47  ;;  %v561_v55 = vadd.f32 %v560_v51, %v180_v48  ;;  %v601_v43 = vpop.f32.mrf.mxu1 }
 0x102   :  { %v562_v54 = vpop.f32.mrf.mxu0  ;;  %v602_v4 = vadd.f32 %v601_v43, %v253_v61 }
 0x103   :  { %v608_v56 = vmul.f32 0.5, %v561_v55  ;;  %v563_v25 = vadd.f32 %v562_v54, %v182_v52  ;;  %v603_v2 = vpop.f32.mrf.mxu1 }
 0x104   :  { %v564_v0 = vpop.f32.mrf.mxu0  ;;  %v604_v42 = vadd.f32 %v603_v2, %v255_v3  ;;  %v616_v48 = vmul.f32 0.5, %v602_v4 }
 0x105   :  { %4411 = vtanh.f32 %v608_v56  ;;  %v612_v57 = vmul.f32 0.5, %v563_v25  ;;  %v605_v63 = vpop.f32.mrf.mxu1 }
 0x106   :  { %v565_v14 = vpop.f32.mrf.mxu0 }
 0x107   :  { %4413 = vtanh.f32 %v612_v57  ;;  %v606_v47 = vpop.f32.mrf.mxu1  ;;  %v5390_v57 = vmov 0   ;;  %v5391_v14 = vmov 0.0  }
 0x108   :  { %4415 = vtanh.f32 %v604_v42 }
 0x109   :  { %4417 = vtanh.f32 %v616_v48 }
 0x112   :  { %v4412_v55 = vpop.eup %4411 }
 0x113   :  { %v610_v54 = vadd.f32 1.0, %v4412_v55 }
 0x114   :  { %v4414_v51 = vpop.eup %4413 }
 0x115   :  { %v611_v52 = vmul.f32 0.5, %v610_v54  ;;  %v614_v0 = vadd.f32 1.0, %v4414_v51  ;;  %v4416_v1 = vpop.eup %4415 }
 0x116   :  { %v4418_v2 = vpop.eup %4417 }
 0x117   :  { %v615_v62 = vmul.f32 0.5, %v614_v0  ;;  %v621_v25 = vmul.f32 0.0, %v611_v52  ;;  %v618_v47 = vadd.f32 1.0, %v4418_v2 }
 0x119   :  { %v622_v56 = vmul.f32 %v4416_v1, %v615_v62  ;;  %v619_v58 = vmul.f32 0.5, %v618_v47 }
 0x11b   :  { %v4879_v63 = vadd.f32 %v622_v56, %v621_v25 }
 0x11d   :  { %4419 = vtanh.f32 %v4879_v63 }
 0x12a   :  { %v4420_v59 = vpop.eup %4419 }
 0x12b   :  { %v625_v43 = vmul.f32 %v4420_v59, %v619_v58  ;;  %v4492_v59 = vld [vmem:[#allocation2 + $0xe8] ss:$16 sps:$4 sm:$0xff]  }
 0x12d   :  { %v626_v3 = vpack.c.bf16 %v625_v43, %v625_v43  ;;  %v4493_v43 = vld [vmem:[#allocation2 + $0xcc] ss:$16 sps:$4 sm:$0xff]  }
 0x12f   :  { %4039 = vmatmul.mubr.bf16.vlgmr.msra.gmra.mxu0 %v626_v3  ;;  %970 = vmatmul.mubr.bf16.vlgmr.msra.gmra.mxu1 %v626_v3 }
 0x130   :  { %979 = vmatpush1.bf16.msra.mxu0 %v4642_v8  ;;  %1010 = vmatprep.mubr.bf16.mxu0 %v5390_v57  ;;  %v4261_v8 = vld [vmem:[#allocation7 + $0x28] sm:$0xff]  }
 0x131   :  { %980 = vmatprep.subr.bf16.mxu0 %v4655_v12  ;;  %4058 = vmatprep.mubr.msk.bf16.mxu1 %vm4576_vm1, %v5391_v14  ;;  %v4264_v12 = vld [vmem:[#allocation7 + $0x10] sm:$0xff]  }
 0x134   :  { %981 = vmatpush1.bf16.msra.mxu0 %v4659_v13  ;;  %v4265_v13 = vld [vmem:[#allocation7 + $0x8] sm:$0xff]  }
 0x135   :  { %982 = vmatprep.subr.bf16.mxu0 %v4672_v17  ;;  %v4928_v17 = vld [vmem:[%s5367_s5] ss:$0 sm:$0xff] }
 0x138   :  { %983 = vmatpush1.bf16.msra.mxu0 %v4676_v18 }
 0x139   :  { %984 = vmatprep.subr.bf16.mxu0 %v4683_v20 }
 0x13c   :  { %985 = vmatpush1.bf16.msra.mxu0 %v4691_v22 }
 0x13d   :  { %986 = vmatprep.subr.bf16.mxu0 %v4697_v24 }
 0x140   :  { %987 = vmatpush1.bf16.msra.mxu0 %v4707_v27 }
 0x141   :  { %988 = vmatprep.subr.bf16.mxu0 %v4712_v29 }
 0x144   :  { %989 = vmatpush1.bf16.msra.mxu0 %v4719_v31 }
 0x145   :  { %990 = vmatprep.subr.bf16.mxu0 %v4733_v35 }
 0x148   :  { %991 = vmatpush1.bf16.msra.mxu0 %v4735_v36 }
 0x149   :  { %992 = vmatprep.subr.bf16.mxu0 %v4740_v38 }
 0x14c   :  { %993 = vmatpush1.bf16.msra.mxu0 %v4749_v40 }
 0x14d   :  { %1343 = vmatprep.subr.bf16.mxu0 %v4640_v7  ;;  %v4260_v7 = vld [vmem:[#allocation7 + $0x30] sm:$0xff]  }
 0x14f   :  { %1011 = vmatmul.mubr.bf16.vlgmr.msra.gmra.mxu0 %v626_v3  ;;  %v4495_v3 = vld [vmem:[#allocation2 + $0xac] ss:$16 sps:$4 sm:$0xff]  }
 0x150   :  { %1344 = vmatpush1.bf16.msra.mxu0 %v4638_v6  ;;  %1375 = vmatprep.mubr.bf16.mxu0 %v5390_v57  ;;  %v4259_v6 = vld [vmem:[#allocation7 + $0x38] sm:$0xff]  }
 0x151   :  { %1345 = vmatprep.subr.bf16.mxu0 %v4649_v10  ;;  %4043 = vmatpush3.bf16.msra.mxu1 %v4259_v6  ;;  %v4262_v10 = vld [vmem:[#allocation7 + $0x20] sm:$0xff]   ;;  %v4496_v6 = vld [vmem:[#allocation2 + $0xa8] ss:$16 sps:$4 sm:$0xff]  }
 0x152   :  { %4044 = vmatprep.subr.bf16.mxu1 %v5391_v14 }
 0x154   :  { %1346 = vmatpush1.bf16.msra.mxu0 %v4653_v11  ;;  %v4263_v11 = vld [vmem:[#allocation7 + $0x18] sm:$0xff]  }
 0x155   :  { %1347 = vmatprep.subr.bf16.mxu0 %v4667_v15  ;;  %4045 = vmatpush3.bf16.msra.mxu1 %v4260_v7  ;;  %v4266_v15 = vld [vmem:[#allocation7] sm:$0xff]   ;;  %v4497_v7 = vld [vmem:[#allocation2 + $0x8c] ss:$16 sps:$4 sm:$0xff]  }
 0x156   :  { %4046 = vmatprep.subr.bf16.mxu1 %v5391_v14 }
 0x158   :  { %1348 = vmatpush1.bf16.msra.mxu0 %v4670_v16  ;;  %v4491_v16 = vld [vmem:[#allocation2 + $0xec] ss:$16 sps:$4 sm:$0xff]  }
 0x159   :  { %1349 = vmatprep.subr.bf16.mxu0 %v4678_v19  ;;  %4047 = vmatpush3.bf16.msra.mxu1 %v4261_v8  ;;  %v4498_v8 = vld [vmem:[#allocation2 + $0x88] ss:$16 sps:$4 sm:$0xff]  }
 0x15a   :  { %4048 = vmatprep.subr.bf16.mxu1 %v5391_v14 }
 0x15c   :  { %1350 = vmatpush1.bf16.msra.mxu0 %v4686_v21 }
 0x15d   :  { %1351 = vmatprep.subr.bf16.mxu0 %v4693_v23  ;;  %4049 = vmatpush3.bf16.msra.mxu1 %v4262_v10  ;;  %v4499_v10 = vld [vmem:[#allocation2 + $0x6c] ss:$16 sps:$4 sm:$0xff]  }
 0x15e   :  { %4050 = vmatprep.subr.bf16.mxu1 %v5391_v14 }
 0x160   :  { %1352 = vmatpush1.bf16.msra.mxu0 %v4703_v26 }
 0x161   :  { %1353 = vmatprep.subr.bf16.mxu0 %v4709_v28  ;;  %4051 = vmatpush3.bf16.msra.mxu1 %v4263_v11  ;;  %v4500_v11 = vld [vmem:[#allocation2 + $0x68] ss:$16 sps:$4 sm:$0xff]  }
 0x162   :  { %4052 = vmatprep.subr.bf16.mxu1 %v5391_v14 }
 0x164   :  { %1354 = vmatpush1.bf16.msra.mxu0 %v4716_v30 }
 0x165   :  { %1355 = vmatprep.subr.bf16.mxu0 %v4727_v33  ;;  %4053 = vmatpush3.bf16.msra.mxu1 %v4264_v12  ;;  %v4501_v12 = vld [vmem:[#allocation2 + $0x4c] ss:$16 sps:$4 sm:$0xff]  }
 0x166   :  { %4054 = vmatprep.subr.bf16.mxu1 %v5391_v14 }
 0x168   :  { %1356 = vmatpush1.bf16.msra.mxu0 %v4731_v34 }
 0x169   :  { %1357 = vmatprep.subr.bf16.mxu0 %v4737_v37  ;;  %4055 = vmatpush3.bf16.msra.mxu1 %v4265_v13  ;;  %v4267_v13 = vld [vmem:[#allocation7 + $0x38] sm:$0xff]  }
 0x16a   :  { %4056 = vmatprep.subr.bf16.mxu1 %v5391_v14 }
 0x16c   :  { %1358 = vmatpush1.bf16.msra.mxu0 %v4745_v39 }
 0x16d   :  { %4062 = vmatprep.subr.bf16.mxu0 %v5391_v14  ;;  %4057 = vmatpush3.bf16.msra.mxu1 %v4266_v15  ;;  %v4948_v15 = vld [vmem:[#allocation2 + $0xe4] ss:$16 sps:$4 sm:$0xff]  }
 0x16e   :  { %1384 = vmatprep.subr.bf16.mxu1 %v4491_v16  ;;  %v4950_v16 = vld [vmem:[#allocation2 + $0xe0] ss:$16 sps:$4 sm:$0xff]  }
 0x1ef   :  { %v731_v18 = vpop.f32.mrf.mxu0  ;;  %v971_v19 = vpop.f32.mrf.mxu1 }
 0x1f0   :  { %v732_v20 = vadd.f32 %v4928_v17, %v731_v18  ;;  %v972_v28 = vadd.f32 %v971_v19, %v4803_v5  ;;  %v4964_v18 = vld [vmem:[#allocation2 + $0xa0] ss:$16 sps:$4 sm:$0xff]  }
 0x1f1   :  { %v4040_v21 = vpop.f32.mrf.mxu0  ;;  %v973_v22 = vpop.f32.mrf.mxu1  ;;  %v4279_v19 = vld [vmem:[#allocation7 + $0x20] sm:$0xff]  }
 0x1f2   :  { %737 = vst [vmem:[#allocation10] sm:$0xff] %v732_v20  ;;  %v974_v29 = vadd.f32 %v973_v22, %v4808_v32  ;;  %v1019_v30 = vmul.f32 0.5, %v972_v28  ;;  %v4969_v20 = vld [vmem:[#allocation2 + $0x84] ss:$16 sps:$4 sm:$0xff]   ;;  %v4971_v21 = vld [vmem:[#allocation2 + $0x80] ss:$16 sps:$4 sm:$0xff]  }
 0x1f3   :  { %v734_v23 = vpop.f32.mrf.mxu0  ;;  %v975_v24 = vpop.f32.mrf.mxu1  ;;  %v4283_v22 = vld [vmem:[#allocation7 + $0x18] sm:$0xff]   ;;  %v4985_v28 = vld [vmem:[#allocation2 + $0x40] ss:$16 sps:$4 sm:$0xff]  }
 0x1f4   :  { %v1023_v33 = vmul.f32 0.5, %v974_v29  ;;  %4421 = vtanh.f32 %v1019_v30  ;;  %v4976_v23 = vld [vmem:[#allocation2 + $0x60] ss:$16 sps:$4 sm:$0xff]   ;;  %v4978_v24 = vld [vmem:[#allocation2 + $0x64] ss:$16 sps:$4 sm:$0xff]   ;;  %v4291_v30 = vld [vmem:[#allocation7 + $0x8] sm:$0xff]  }
 0x1f5   :  { %v4041_v26 = vpop.f32.mrf.mxu0  ;;  %v976_v27 = vpop.f32.mrf.mxu1  ;;  %v4988_v29 = vld [vmem:[#allocation2 + $0x24] ss:$16 sps:$4 sm:$0xff]  }
 0x1f6   :  { %4423 = vtanh.f32 %v1023_v33  ;;  %v4980_v26 = vld [vmem:[#allocation2 + $0x44] ss:$16 sps:$4 sm:$0xff]   ;;  %v4992_v33 = vld [vmem:[#allocation2 + $0x20] ss:$16 sps:$4 sm:$0xff]  }
 0x1f7   :  { %v4287_v27 = vld [vmem:[#allocation7 + $0x10] sm:$0xff]  }
 0x201   :  { %v4422_v48 = vpop.eup %4421 }
 0x202   :  { %v1021_v54 = vadd.f32 1.0, %v4422_v48 }
 0x203   :  { %v4424_v55 = vpop.eup %4423 }
 0x204   :  { %v1025_v5 = vadd.f32 1.0, %v4424_v55  ;;  %v1022_v52 = vmul.f32 0.5, %v1021_v54 }
 0x206   :  { %v1026_v32 = vmul.f32 0.5, %v1025_v5  ;;  %v1032_v62 = vmul.f32 %v1022_v52, %v4879_v63  ;;  %v4494_v63 = vld [vmem:[#allocation2 + $0xc8] ss:$16 sps:$4 sm:$0xff]  }
 0x20f   :  { %v1012_v34 = vpop.f32.mrf.mxu0 }
 0x210   :  { %v1013_v4 = vadd.f32 %v1012_v34, %v4806_v9  ;;  %v4995_v34 = vld [vmem:[#allocation2 + $0x4] ss:$16 sps:$4 sm:$0xff]  }
 0x211   :  { %v1014_v37 = vpop.f32.mrf.mxu0 }
 0x212   :  { %v1015_v39 = vadd.f32 %v1014_v37, %v4811_v41  ;;  %v1027_v51 = vmul.f32 0.5, %v1013_v4  ;;  %v4295_v37 = vld [vmem:[#allocation7] sm:$0xff]  }
 0x213   :  { %v1016_v42 = vpop.f32.mrf.mxu0 }
 0x214   :  { %4425 = vtanh.f32 %v1015_v39  ;;  %v4999_v39 = vld [vmem:[#allocation2] ss:$16 sps:$4 sm:$0xff]   ;;  %v5001_v42 = vld [vmem:[#allocation2 + $0xec] ss:$16 sps:$4 sm:$0xff]  }
 0x215   :  { %v1017_v61 = vpop.f32.mrf.mxu0  ;;  %4427 = vtanh.f32 %v1027_v51 }
 0x221   :  { %v4426_v0 = vpop.eup %4425 }
 0x222   :  { %v1033_v1 = vmul.f32 %v4426_v0, %v1026_v32  ;;  %v4428_v41 = vpop.eup %4427 }
 0x223   :  { %v1029_v56 = vadd.f32 1.0, %v4428_v41 }
 0x224   :  { %v4936_v25 = vadd.f32 %v1033_v1, %v1032_v62 }
 0x225   :  { %v1030_v2 = vmul.f32 0.5, %v1029_v56 }
 0x226   :  { %4429 = vtanh.f32 %v4936_v25 }
 0x233   :  { %v4430_v9 = vpop.eup %4429 }
 0x234   :  { %v1036_v47 = vmul.f32 %v4430_v9, %v1030_v2 }
 0x236   :  { %v1037_v58 = vpack.c.bf16 %v1036_v47, %v1036_v47 }
 0x238   :  { %4059 = vmatmul.mubr.bf16.vlgmr.msra.gmra.mxu1 %v1037_v58  ;;  %1376 = vmatmul.mubr.bf16.vlgmr.msra.gmra.mxu0 %v1037_v58 }
 0x239   :  { %1385 = vmatpush1.bf16.msra.mxu1 %v4492_v59  ;;  %1416 = vmatprep.mubr.bf16.mxu1 %v5390_v57 }
 0x23a   :  { %1386 = vmatprep.subr.bf16.mxu1 %v4493_v43  ;;  %4078 = vmatprep.mubr.msk.bf16.mxu0 %vm4576_vm1, %v5391_v14 }
 0x23b   :  { %4063 = vmatpush3.bf16.msra.mxu0 %v4267_v13 }
 0x23c   :  { %4064 = vmatprep.subr.bf16.mxu0 %v5391_v14 }
 0x23d   :  { %1387 = vmatpush1.bf16.msra.mxu1 %v4494_v63 }
 0x23e   :  { %1388 = vmatprep.subr.bf16.mxu1 %v4495_v3 }
 0x241   :  { %1389 = vmatpush1.bf16.msra.mxu1 %v4496_v6 }
 0x242   :  { %1390 = vmatprep.subr.bf16.mxu1 %v4497_v7 }
 0x245   :  { %1391 = vmatpush1.bf16.msra.mxu1 %v4498_v8 }
 0x246   :  { %1392 = vmatprep.subr.bf16.mxu1 %v4499_v10 }
 0x249   :  { %1393 = vmatpush1.bf16.msra.mxu1 %v4500_v11 }
 0x24a   :  { %1394 = vmatprep.subr.bf16.mxu1 %v4501_v12 }
 0x24d   :  { %1395 = vmatpush1.bf16.msra.mxu1 %v4719_v31  ;;  %v4271_v31 = vld [vmem:[#allocation7 + $0x30] sm:$0xff]  }
 0x24e   :  { %1396 = vmatprep.subr.bf16.mxu1 %v4733_v35  ;;  %v4955_v35 = vld [vmem:[#allocation2 + $0xc4] ss:$16 sps:$4 sm:$0xff]   ;;  %4065 = vmatpush3.bf16.msra.mxu0 %v4271_v31 }
 0x24f   :  { %4066 = vmatprep.subr.bf16.mxu0 %v5391_v14 }
 0x251   :  { %1397 = vmatpush1.bf16.msra.mxu1 %v4735_v36  ;;  %v4957_v36 = vld [vmem:[#allocation2 + $0xc0] ss:$16 sps:$4 sm:$0xff]  }
 0x252   :  { %1398 = vmatprep.subr.bf16.mxu1 %v4740_v38  ;;  %v4275_v38 = vld [vmem:[#allocation7 + $0x28] sm:$0xff]  }
 0x253   :  { %4067 = vmatpush3.bf16.msra.mxu0 %v4275_v38 }
 0x254   :  { %4068 = vmatprep.subr.bf16.mxu0 %v5391_v14 }
 0x255   :  { %1399 = vmatpush1.bf16.msra.mxu1 %v4749_v40  ;;  %v4962_v40 = vld [vmem:[#allocation2 + $0xa4] ss:$16 sps:$4 sm:$0xff]  }
 0x256   :  { %1749 = vmatprep.subr.bf16.mxu1 %v4948_v15 }
 0x257   :  { %4069 = vmatpush3.bf16.msra.mxu0 %v4279_v19  ;;  %v5016_v19 = vld [vmem:[#allocation2 + $0xe8] ss:$16 sps:$4 sm:$0xff]  }
 0x258   :  { %1417 = vmatmul.mubr.bf16.vlgmr.msra.gmra.mxu1 %v1037_v58  ;;  %4070 = vmatprep.subr.bf16.mxu0 %v5391_v14 }
 0x259   :  { %1781 = vmatprep.mubr.bf16.mxu1 %v5390_v57  ;;  %1750 = vmatpush1.bf16.msra.mxu1 %v4950_v16 }
 0x25a   :  { %1751 = vmatprep.subr.bf16.mxu1 %v4955_v35 }
 0x25b   :  { %4071 = vmatpush3.bf16.msra.mxu0 %v4283_v22 }
 0x25c   :  { %4072 = vmatprep.subr.bf16.mxu0 %v5391_v14 }
 0x25d   :  { %1752 = vmatpush1.bf16.msra.mxu1 %v4957_v36 }
 0x25e   :  { %1753 = vmatprep.subr.bf16.mxu1 %v4962_v40 }
 0x25f   :  { %4073 = vmatpush3.bf16.msra.mxu0 %v4287_v27  ;;  %v5018_v27 = vld [vmem:[#allocation2 + $0xcc] ss:$16 sps:$4 sm:$0xff]  }
 0x260   :  { %4074 = vmatprep.subr.bf16.mxu0 %v5391_v14 }
 0x261   :  { %1754 = vmatpush1.bf16.msra.mxu1 %v4964_v18 }
 0x262   :  { %1755 = vmatprep.subr.bf16.mxu1 %v4969_v20 }
 0x263   :  { %4075 = vmatpush3.bf16.msra.mxu0 %v4291_v30  ;;  %v5025_v30 = vld [vmem:[#allocation2 + $0xac] ss:$16 sps:$4 sm:$0xff]  }
 0x264   :  { %4076 = vmatprep.subr.bf16.mxu0 %v5391_v14 }
 0x265   :  { %1756 = vmatpush1.bf16.msra.mxu1 %v4971_v21 }
 0x266   :  { %1757 = vmatprep.subr.bf16.mxu1 %v4978_v24 }
 0x267   :  { %4077 = vmatpush3.bf16.msra.mxu0 %v4295_v37  ;;  %v5030_v37 = vld [vmem:[#allocation2 + $0xa8] ss:$16 sps:$4 sm:$0xff]  }
 0x268   :  { %1790 = vmatprep.subr.bf16.mxu0 %v5001_v42 }
 0x269   :  { %1758 = vmatpush1.bf16.msra.mxu1 %v4976_v23 }
 0x26a   :  { %1759 = vmatprep.subr.bf16.mxu1 %v4980_v26 }
 0x26d   :  { %1760 = vmatpush1.bf16.msra.mxu1 %v4985_v28 }
 0x26e   :  { %1761 = vmatprep.subr.bf16.mxu1 %v4988_v29 }
 0x271   :  { %1762 = vmatpush1.bf16.msra.mxu1 %v4992_v33 }
 0x272   :  { %1763 = vmatprep.subr.bf16.mxu1 %v4995_v34 }
 0x275   :  { %1764 = vmatpush1.bf16.msra.mxu1 %v4999_v39 }
 0x276   :  { %4082 = vmatprep.subr.bf16.mxu1 %v5391_v14 }
 0x2f8   :  { %v1136_v61 = vpop.f32.mrf.mxu1  ;;  %v1377_v4 = vpop.f32.mrf.mxu0 }
 0x2f9   :  { %v1137_v48 = vadd.f32 %v4928_v17, %v1136_v61  ;;  %v1378_v0 = vadd.f32 %v1377_v4, %v4813_v45  ;;  %v5033_v61 = vld [vmem:[#allocation2 + $0x8c] ss:$16 sps:$4 sm:$0xff]   ;;  %v5036_v4 = vld [vmem:[#allocation2 + $0x88] ss:$16 sps:$4 sm:$0xff]  }
 0x2fa   :  { %v4060_v55 = vpop.f32.mrf.mxu1  ;;  %v1379_v54 = vpop.f32.mrf.mxu0 }
 0x2fb   :  { %1143 = vst [vmem:[#allocation10 + $0x8] sm:$0xff] %v1137_v48  ;;  %v1380_v62 = vadd.f32 %v1379_v54, %v4818_v49  ;;  %v1425_v1 = vmul.f32 0.5, %v1378_v0  ;;  %v5039_v48 = vld [vmem:[#allocation2 + $0x6c] ss:$16 sps:$4 sm:$0xff]   ;;  %v5042_v55 = vld [vmem:[#allocation2 + $0x68] ss:$16 sps:$4 sm:$0xff]  }
 0x2fc   :  { %v1139_v51 = vpop.f32.mrf.mxu1  ;;  %v1381_v5 = vpop.f32.mrf.mxu0  ;;  %v5045_v54 = vld [vmem:[#allocation2 + $0x4c] ss:$16 sps:$4 sm:$0xff]   ;;  %v5060_v0 = vld [vmem:[#allocation2 + $0x8] ss:$16 sps:$4 sm:$0xff]  }
 0x2fd   :  { %v1429_v41 = vmul.f32 0.5, %v1380_v62  ;;  %4431 = vtanh.f32 %v1425_v1  ;;  %v5048_v51 = vld [vmem:[#allocation2 + $0x48] ss:$16 sps:$4 sm:$0xff]   ;;  %v5051_v5 = vld [vmem:[#allocation2 + $0x2c] ss:$16 sps:$4 sm:$0xff]   ;;  %v4324_v1 = vld [vmem:[#allocation7 + $0x30] sm:$0xff]  }
 0x2fe   :  { %v4061_v52 = vpop.f32.mrf.mxu1  ;;  %v1382_v32 = vpop.f32.mrf.mxu0  ;;  %v4323_v62 = vld [vmem:[#allocation7 + $0x38] sm:$0xff]  }
 0x2ff   :  { %4433 = vtanh.f32 %v1429_v41  ;;  %v5054_v52 = vld [vmem:[#allocation2 + $0x28] ss:$16 sps:$4 sm:$0xff]   ;;  %v5057_v32 = vld [vmem:[#allocation2 + $0xc] ss:$16 sps:$4 sm:$0xff]  }
 0x300   :  { %v4325_v41 = vld [vmem:[#allocation7 + $0x28] sm:$0xff]  }
 0x30a   :  { %v4432_v43 = vpop.eup %4431 }
 0x30b   :  { %v1427_v3 = vadd.f32 1.0, %v4432_v43 }
 0x30c   :  { %v4434_v63 = vpop.eup %4433 }
 0x30d   :  { %v1431_v45 = vadd.f32 1.0, %v4434_v63  ;;  %v1428_v7 = vmul.f32 0.5, %v1427_v3 }
 0x30f   :  { %v1432_v49 = vmul.f32 0.5, %v1431_v45  ;;  %v1438_v10 = vmul.f32 %v1428_v7, %v4936_v25  ;;  %v5021_v25 = vld [vmem:[#allocation2 + $0xc8] ss:$16 sps:$4 sm:$0xff]  }
 0x318   :  { %v1418_v56 = vpop.f32.mrf.mxu1 }
 0x319   :  { %v1419_v59 = vadd.f32 %v1418_v56, %v4816_v46  ;;  %v4326_v56 = vld [vmem:[#allocation7 + $0x20] sm:$0xff]  }
 0x31a   :  { %v1420_v2 = vpop.f32.mrf.mxu1 }
 0x31b   :  { %v1421_v9 = vadd.f32 %v1420_v2, %v4821_v50  ;;  %v1433_v6 = vmul.f32 0.5, %v1419_v59  ;;  %v4327_v2 = vld [vmem:[#allocation7 + $0x18] sm:$0xff]  }
 0x31c   :  { %v1422_v47 = vpop.f32.mrf.mxu1 }
 0x31d   :  { %4435 = vtanh.f32 %v1421_v9  ;;  %v4328_v9 = vld [vmem:[#allocation7 + $0x10] sm:$0xff]   ;;  %v4329_v47 = vld [vmem:[#allocation7 + $0x8] sm:$0xff]  }
 0x31e   :  { %v1423_v58 = vpop.f32.mrf.mxu1  ;;  %4437 = vtanh.f32 %v1433_v6 }
 0x31f   :  { %v4330_v58 = vld [vmem:[#allocation7] sm:$0xff]  }
 0x32a   :  { %v4436_v8 = vpop.eup %4435 }
 0x32b   :  { %v1439_v11 = vmul.f32 %v4436_v8, %v1432_v49  ;;  %v4438_v50 = vpop.eup %4437 }
 0x32c   :  { %v1435_v13 = vadd.f32 1.0, %v4438_v50 }
 0x32d   :  { %v5013_v12 = vadd.f32 %v1439_v11, %v1438_v10 }
 0x32e   :  { %v1436_v31 = vmul.f32 0.5, %v1435_v13 }
 0x32f   :  { %4439 = vtanh.f32 %v5013_v12 }
 0x33c   :  { %v4440_v46 = vpop.eup %4439 }
 0x33d   :  { %v1442_v38 = vmul.f32 %v4440_v46, %v1436_v31 }
 0x33f   :  { %v1443_v22 = vpack.c.bf16 %v1442_v38, %v1442_v38  ;;  %v5392_v38 = vld [vmem:[#allocation19_spill] sm:$0xff] }
 0x341   :  { %4079 = vmatmul.mubr.bf16.vlgmr.msra.gmra.mxu0 %v1443_v22  ;;  %1782 = vmatmul.mubr.bf16.vlgmr.msra.gmra.mxu1 %v1443_v22 }
 0x342   :  { %1791 = vmatpush1.bf16.msra.mxu0 %v5016_v19  ;;  %1822 = vmatprep.mubr.bf16.mxu0 %v5390_v57 }
 0x343   :  { %1792 = vmatprep.subr.bf16.mxu0 %v5018_v27  ;;  %4098 = vmatprep.mubr.msk.bf16.mxu1 %vm4576_vm1, %v5391_v14 }
 0x344   :  { %4083 = vmatpush3.bf16.msra.mxu1 %v4323_v62 }
 0x345   :  { %4084 = vmatprep.subr.bf16.mxu1 %v5391_v14 }
 0x346   :  { %1793 = vmatpush1.bf16.msra.mxu0 %v5021_v25 }
 0x347   :  { %1794 = vmatprep.subr.bf16.mxu0 %v5025_v30 }
 0x348   :  { %4085 = vmatpush3.bf16.msra.mxu1 %v4324_v1 }
 0x349   :  { %4086 = vmatprep.subr.bf16.mxu1 %v5391_v14 }
 0x34a   :  { %1795 = vmatpush1.bf16.msra.mxu0 %v5030_v37 }
 0x34b   :  { %1796 = vmatprep.subr.bf16.mxu0 %v5033_v61 }
 0x34c   :  { %4087 = vmatpush3.bf16.msra.mxu1 %v4325_v41  ;;  %v5393_v41 = vld [vmem:[#allocation18_spill] sm:$0xff] }
 0x34d   :  { %4088 = vmatprep.subr.bf16.mxu1 %v5391_v14 }
 0x34e   :  { %1797 = vmatpush1.bf16.msra.mxu0 %v5036_v4 }
 0x34f   :  { %1798 = vmatprep.subr.bf16.mxu0 %v5039_v48 }
 0x350   :  { %4089 = vmatpush3.bf16.msra.mxu1 %v4326_v56 }
 0x351   :  { %4090 = vmatprep.subr.bf16.mxu1 %v5391_v14 }
 0x352   :  { %1799 = vmatpush1.bf16.msra.mxu0 %v5042_v55 }
 0x353   :  { %1800 = vmatprep.subr.bf16.mxu0 %v5045_v54 }
 0x354   :  { %4091 = vmatpush3.bf16.msra.mxu1 %v4327_v2 }
 0x355   :  { %4092 = vmatprep.subr.bf16.mxu1 %v5391_v14 }
 0x356   :  { %1801 = vmatpush1.bf16.msra.mxu0 %v5048_v51 }
 0x357   :  { %1802 = vmatprep.subr.bf16.mxu0 %v5051_v5 }
 0x358   :  { %4093 = vmatpush3.bf16.msra.mxu1 %v4328_v9 }
 0x359   :  { %4094 = vmatprep.subr.bf16.mxu1 %v5391_v14 }
 0x35a   :  { %1803 = vmatpush1.bf16.msra.mxu0 %v5054_v52 }
 0x35b   :  { %1804 = vmatprep.subr.bf16.mxu0 %v5057_v32 }
 0x35c   :  { %4095 = vmatpush3.bf16.msra.mxu1 %v4329_v47 }
 0x35d   :  { %4096 = vmatprep.subr.bf16.mxu1 %v5391_v14 }
 0x35e   :  { %1805 = vmatpush1.bf16.msra.mxu0 %v5060_v0 }
 0x35f   :  { %2155 = vmatprep.subr.bf16.mxu0 %v4948_v15 }
 0x360   :  { %4097 = vmatpush3.bf16.msra.mxu1 %v4330_v58 }
 0x361   :  { %1823 = vmatmul.mubr.bf16.vlgmr.msra.gmra.mxu0 %v1443_v22  ;;  %2196 = vmatprep.subr.bf16.mxu1 %v5001_v42 }
 0x362   :  { %2156 = vmatpush1.bf16.msra.mxu0 %v4950_v16  ;;  %2187 = vmatprep.mubr.bf16.mxu0 %v5390_v57 }
 0x363   :  { %2157 = vmatprep.subr.bf16.mxu0 %v4955_v35 }
 0x366   :  { %2158 = vmatpush1.bf16.msra.mxu0 %v4957_v36 }
 0x367   :  { %2159 = vmatprep.subr.bf16.mxu0 %v4962_v40 }
 0x36a   :  { %2160 = vmatpush1.bf16.msra.mxu0 %v4964_v18 }
 0x36b   :  { %2161 = vmatprep.subr.bf16.mxu0 %v4969_v20 }
 0x36e   :  { %2162 = vmatpush1.bf16.msra.mxu0 %v4971_v21 }
 0x36f   :  { %2163 = vmatprep.subr.bf16.mxu0 %v4978_v24 }
 0x372   :  { %2164 = vmatpush1.bf16.msra.mxu0 %v4976_v23 }
 0x373   :  { %2165 = vmatprep.subr.bf16.mxu0 %v4980_v26 }
 0x376   :  { %2166 = vmatpush1.bf16.msra.mxu0 %v4985_v28 }
 0x377   :  { %2167 = vmatprep.subr.bf16.mxu0 %v4988_v29 }
 0x37a   :  { %2168 = vmatpush1.bf16.msra.mxu0 %v4992_v33 }
 0x37b   :  { %2169 = vmatprep.subr.bf16.mxu0 %v4995_v34 }
 0x37e   :  { %2170 = vmatpush1.bf16.msra.mxu0 %v4999_v39 }
 0x37f   :  { %4102 = vmatprep.subr.bf16.mxu0 %v5391_v14 }
 0x401   :  { %v1542_v59 = vpop.f32.mrf.mxu0  ;;  %v1783_v43 = vpop.f32.mrf.mxu1 }
 0x402   :  { %v1543_v63 = vadd.f32 %v4928_v17, %v1542_v59  ;;  %v1784_v10 = vadd.f32 %v1783_v43, %v4823_v53 }
 0x403   :  { %v4080_v3 = vpop.f32.mrf.mxu0  ;;  %v1785_v6 = vpop.f32.mrf.mxu1 }
 0x404   :  { %1549 = vst [vmem:[#allocation10 + $0x10] sm:$0xff] %v1543_v63  ;;  %v1786_v11 = vadd.f32 %v1785_v6, %v4828_v60  ;;  %v1831_v50 = vmul.f32 0.5, %v1784_v10 }
 0x405   :  { %v1545_v45 = vpop.f32.mrf.mxu0  ;;  %v1787_v7 = vpop.f32.mrf.mxu1 }
 0x406   :  { %v1835_v13 = vmul.f32 0.5, %v1786_v11  ;;  %4441 = vtanh.f32 %v1831_v50  ;;  %v5394_v50 = vld [vmem:[#allocation20_spill] sm:$0xff] }
 0x407   :  { %v4081_v49 = vpop.f32.mrf.mxu0  ;;  %v1788_v8 = vpop.f32.mrf.mxu1 }
 0x408   :  { %4443 = vtanh.f32 %v1835_v13 }
 0x413   :  { %v4442_v2 = vpop.eup %4441 }
 0x414   :  { %v1833_v47 = vadd.f32 1.0, %v4442_v2 }
 0x415   :  { %v4444_v9 = vpop.eup %4443 }
 0x416   :  { %v1837_v53 = vadd.f32 1.0, %v4444_v9  ;;  %v1834_v59 = vmul.f32 0.5, %v1833_v47  ;;  %v5397_v9 = vld [vmem:[#allocation21_spill] sm:$0xff] }
 0x418   :  { %v1838_v60 = vmul.f32 0.5, %v1837_v53  ;;  %v1844_v63 = vmul.f32 %v1834_v59, %v5013_v12 }
 0x421   :  { %v1824_v31 = vpop.f32.mrf.mxu0 }
 0x422   :  { %v1825_v56 = vadd.f32 %v1824_v31, %v5393_v41  ;;  %v5395_v31 = vld [vmem:[#allocation22_spill] sm:$0xff] }
 0x423   :  { %v1826_v46 = vpop.f32.mrf.mxu0 }
 0x424   :  { %v1827_v22 = vadd.f32 %v1826_v46, %v5392_v38  ;;  %v1839_v58 = vmul.f32 0.5, %v1825_v56 }
 0x425   :  { %v1828_v62 = vpop.f32.mrf.mxu0 }
 0x426   :  { %4445 = vtanh.f32 %v1827_v22 }
 0x427   :  { %v1829_v1 = vpop.f32.mrf.mxu0  ;;  %4447 = vtanh.f32 %v1839_v58 }
 0x428   :  { %v5396_v1 = vld [vmem:[#allocation23_spill] sm:$0xff] }
 0x433   :  { %v4446_v43 = vpop.eup %4445 }
 0x434   :  { %v1845_v3 = vmul.f32 %v4446_v43, %v1838_v60  ;;  %v4448_v45 = vpop.eup %4447 }
 0x435   :  { %v1841_v7 = vadd.f32 1.0, %v4448_v45 }
 0x436   :  { %v5096_v6 = vadd.f32 %v1845_v3, %v1844_v63 }
 0x437   :  { %v1842_v49 = vmul.f32 0.5, %v1841_v7 }
 0x438   :  { %4449 = vtanh.f32 %v5096_v6 }
 0x445   :  { %v4450_v8 = vpop.eup %4449 }
 0x446   :  { %v1848_v10 = vmul.f32 %v4450_v8, %v1842_v49 }
 0x448   :  { %v1849_v11 = vpack.c.bf16 %v1848_v10, %v1848_v10 }
 0x44a   :  { %4099 = vmatmul.mubr.bf16.vlgmr.msra.gmra.mxu1 %v1849_v11  ;;  %2188 = vmatmul.mubr.bf16.vlgmr.msra.gmra.mxu0 %v1849_v11 }
 0x44b   :  { %2197 = vmatpush1.bf16.msra.mxu1 %v5016_v19  ;;  %2228 = vmatprep.mubr.bf16.mxu1 %v5390_v57 }
 0x44c   :  { %2198 = vmatprep.subr.bf16.mxu1 %v5018_v27  ;;  %4118 = vmatprep.mubr.msk.bf16.mxu0 %vm4576_vm1, %v5391_v14 }
 0x44f   :  { %2199 = vmatpush1.bf16.msra.mxu1 %v5021_v25 }
 0x450   :  { %2200 = vmatprep.subr.bf16.mxu1 %v5025_v30 }
 0x453   :  { %2201 = vmatpush1.bf16.msra.mxu1 %v5030_v37 }
 0x454   :  { %2202 = vmatprep.subr.bf16.mxu1 %v5033_v61 }
 0x457   :  { %2203 = vmatpush1.bf16.msra.mxu1 %v5036_v4 }
 0x458   :  { %2204 = vmatprep.subr.bf16.mxu1 %v5039_v48 }
 0x45b   :  { %2205 = vmatpush1.bf16.msra.mxu1 %v5042_v55 }
 0x45c   :  { %2206 = vmatprep.subr.bf16.mxu1 %v5045_v54 }
 0x45f   :  { %2207 = vmatpush1.bf16.msra.mxu1 %v5048_v51 }
 0x460   :  { %2208 = vmatprep.subr.bf16.mxu1 %v5051_v5 }
 0x463   :  { %2209 = vmatpush1.bf16.msra.mxu1 %v5054_v52 }
 0x464   :  { %2210 = vmatprep.subr.bf16.mxu1 %v5057_v32 }
 0x467   :  { %2211 = vmatpush1.bf16.msra.mxu1 %v5060_v0 }
 0x468   :  { %2561 = vmatprep.subr.bf16.mxu1 %v4948_v15  ;;  %v4331_v15 = vld [vmem:[#allocation7 + $0x38] sm:$0xff]  }
 0x469   :  { %4103 = vmatpush3.bf16.msra.mxu0 %v4331_v15 }
 0x46a   :  { %2229 = vmatmul.mubr.bf16.vlgmr.msra.gmra.mxu1 %v1849_v11  ;;  %4104 = vmatprep.subr.bf16.mxu0 %v5391_v14 }
 0x46b   :  { %2562 = vmatpush1.bf16.msra.mxu1 %v4950_v16  ;;  %2593 = vmatprep.mubr.bf16.mxu1 %v5390_v57  ;;  %v4332_v16 = vld [vmem:[#allocation7 + $0x30] sm:$0xff]  }
 0x46c   :  { %2563 = vmatprep.subr.bf16.mxu1 %v4955_v35  ;;  %v4333_v35 = vld [vmem:[#allocation7 + $0x28] sm:$0xff]  }
 0x46d   :  { %4105 = vmatpush3.bf16.msra.mxu0 %v4332_v16 }
 0x46e   :  { %4106 = vmatprep.subr.bf16.mxu0 %v5391_v14 }
 0x46f   :  { %2564 = vmatpush1.bf16.msra.mxu1 %v4957_v36  ;;  %v4334_v36 = vld [vmem:[#allocation7 + $0x20] sm:$0xff]  }
 0x470   :  { %2565 = vmatprep.subr.bf16.mxu1 %v4962_v40  ;;  %v4335_v40 = vld [vmem:[#allocation7 + $0x18] sm:$0xff]  }
 0x471   :  { %4107 = vmatpush3.bf16.msra.mxu0 %v4333_v35 }
 0x472   :  { %4108 = vmatprep.subr.bf16.mxu0 %v5391_v14 }
 0x473   :  { %2566 = vmatpush1.bf16.msra.mxu1 %v4964_v18  ;;  %v4336_v18 = vld [vmem:[#allocation7 + $0x10] sm:$0xff]  }
 0x474   :  { %2567 = vmatprep.subr.bf16.mxu1 %v4969_v20  ;;  %v4337_v20 = vld [vmem:[#allocation7 + $0x8] sm:$0xff]  }
 0x475   :  { %4109 = vmatpush3.bf16.msra.mxu0 %v4334_v36 }
 0x476   :  { %4110 = vmatprep.subr.bf16.mxu0 %v5391_v14 }
 0x477   :  { %2568 = vmatpush1.bf16.msra.mxu1 %v4971_v21  ;;  %v4338_v21 = vld [vmem:[#allocation7] sm:$0xff]  }
 0x478   :  { %2569 = vmatprep.subr.bf16.mxu1 %v4978_v24 }
 0x479   :  { %4111 = vmatpush3.bf16.msra.mxu0 %v4335_v40  ;;  %v4359_v40 = vld [vmem:[#allocation7 + $0x10] sm:$0xff]  }
 0x47a   :  { %4112 = vmatprep.subr.bf16.mxu0 %v5391_v14 }
 0x47b   :  { %2570 = vmatpush1.bf16.msra.mxu1 %v4976_v23 }
 0x47c   :  { %2571 = vmatprep.subr.bf16.mxu1 %v4980_v26 }
 0x47d   :  { %4113 = vmatpush3.bf16.msra.mxu0 %v4336_v18  ;;  %v5208_v18 = vld [vmem:[#allocation2 + $0x40] ss:$16 sps:$4 sm:$0xff]  }
 0x47e   :  { %4114 = vmatprep.subr.bf16.mxu0 %v5391_v14 }
 0x47f   :  { %2572 = vmatpush1.bf16.msra.mxu1 %v4985_v28 }
 0x480   :  { %2573 = vmatprep.subr.bf16.mxu1 %v4988_v29 }
 0x481   :  { %4115 = vmatpush3.bf16.msra.mxu0 %v4337_v20  ;;  %v5211_v20 = vld [vmem:[#allocation2 + $0x24] ss:$16 sps:$4 sm:$0xff]  }
 0x482   :  { %4116 = vmatprep.subr.bf16.mxu0 %v5391_v14 }
 0x483   :  { %2574 = vmatpush1.bf16.msra.mxu1 %v4992_v33 }
 0x484   :  { %2575 = vmatprep.subr.bf16.mxu1 %v4995_v34 }
 0x485   :  { %4117 = vmatpush3.bf16.msra.mxu0 %v4338_v21  ;;  %v4363_v21 = vld [vmem:[#allocation7 + $0x8] sm:$0xff]  }
 0x486   :  { %2602 = vmatprep.subr.bf16.mxu0 %v5001_v42 }
 0x487   :  { %2576 = vmatpush1.bf16.msra.mxu1 %v4999_v39 }
 0x488   :  { %4122 = vmatprep.subr.bf16.mxu1 %v5391_v14 }
 0x50a   :  { %v1948_v23 = vpop.f32.mrf.mxu1  ;;  %v2189_v24 = vpop.f32.mrf.mxu0 }
 0x50b   :  { %v1949_v26 = vadd.f32 %v4928_v17, %v1948_v23  ;;  %v2190_v13 = vadd.f32 %v2189_v24, %v5394_v50  ;;  %v5215_v23 = vld [vmem:[#allocation2 + $0x20] ss:$16 sps:$4 sm:$0xff]   ;;  %v5218_v24 = vld [vmem:[#allocation2 + $0x4] ss:$16 sps:$4 sm:$0xff]  }
 0x50c   :  { %v4100_v28 = vpop.f32.mrf.mxu1  ;;  %v2191_v29 = vpop.f32.mrf.mxu0 }
 0x50d   :  { %1955 = vst [vmem:[#allocation10 + $0x18] sm:$0xff] %v1949_v26  ;;  %v2192_v46 = vadd.f32 %v2191_v29, %v5395_v31  ;;  %v2237_v38 = vmul.f32 0.5, %v2190_v13  ;;  %v4367_v26 = vld [vmem:[#allocation7] sm:$0xff]   ;;  %v5224_v29 = vld [vmem:[#allocation2 + $0xec] ss:$16 sps:$4 sm:$0xff]  }
 0x50e   :  { %v1951_v33 = vpop.f32.mrf.mxu1  ;;  %v2193_v34 = vpop.f32.mrf.mxu0  ;;  %v5222_v28 = vld [vmem:[#allocation2] ss:$16 sps:$4 sm:$0xff]  }
 0x50f   :  { %v2241_v22 = vmul.f32 0.5, %v2192_v46  ;;  %4451 = vtanh.f32 %v2237_v38 }
 0x510   :  { %v4101_v39 = vpop.f32.mrf.mxu1  ;;  %v2194_v12 = vpop.f32.mrf.mxu0 }
 0x511   :  { %4453 = vtanh.f32 %v2241_v22  ;;  %v5398_v22 = vld [vmem:[#allocation24_spill] sm:$0xff] }
 0x51c   :  { %v4452_v58 = vpop.eup %4451 }
 0x51d   :  { %v2239_v59 = vadd.f32 1.0, %v4452_v58 }
 0x51e   :  { %v4454_v53 = vpop.eup %4453 }
 0x51f   :  { %v2243_v43 = vadd.f32 1.0, %v4454_v53  ;;  %v2240_v63 = vmul.f32 0.5, %v2239_v59  ;;  %v5401_v59 = vld [vmem:[#allocation25_spill] sm:$0xff] }
 0x521   :  { %v2244_v3 = vmul.f32 0.5, %v2243_v43  ;;  %v2250_v7 = vmul.f32 %v2240_v63, %v5096_v6  ;;  %v5203_v6 = vld [vmem:[#allocation2 + $0x44] ss:$16 sps:$4 sm:$0xff]  }
 0x52a   :  { %v2230_v42 = vpop.f32.mrf.mxu1 }
 0x52b   :  { %v2231_v47 = vadd.f32 %v2230_v42, %v5397_v9 }
 0x52c   :  { %v2232_v62 = vpop.f32.mrf.mxu1 }
 0x52d   :  { %v2233_v41 = vadd.f32 %v2232_v62, %v5396_v1  ;;  %v2245_v60 = vmul.f32 0.5, %v2231_v47  ;;  %v5399_v62 = vld [vmem:[#allocation26_spill] sm:$0xff]  ;;  %v5400_v47 = vld [vmem:[#allocation27_spill] sm:$0xff] }
 0x52e   :  { %v2234_v56 = vpop.f32.mrf.mxu1 }
 0x52f   :  { %4455 = vtanh.f32 %v2233_v41 }
 0x530   :  { %v2235_v2 = vpop.f32.mrf.mxu1  ;;  %4457 = vtanh.f32 %v2245_v60 }
 0x53c   :  { %v4456_v45 = vpop.eup %4455 }
 0x53d   :  { %v2251_v49 = vmul.f32 %v4456_v45, %v2244_v3  ;;  %v4458_v10 = vpop.eup %4457 }
 0x53e   :  { %v2247_v11 = vadd.f32 1.0, %v4458_v10 }
 0x53f   :  { %v5149_v8 = vadd.f32 %v2251_v49, %v2250_v7 }
 0x540   :  { %v2248_v15 = vmul.f32 0.5, %v2247_v11 }
 0x541   :  { %4459 = vtanh.f32 %v5149_v8 }
 0x54e   :  { %v4460_v16 = vpop.eup %4459 }
 0x54f   :  { %v2254_v35 = vmul.f32 %v4460_v16, %v2248_v15 }
 0x551   :  { %v2255_v36 = vpack.c.bf16 %v2254_v35, %v2254_v35 }
 0x553   :  { %4119 = vmatmul.mubr.bf16.vlgmr.msra.gmra.mxu0 %v2255_v36  ;;  %2594 = vmatmul.mubr.bf16.vlgmr.msra.gmra.mxu1 %v2255_v36 }
 0x554   :  { %2603 = vmatpush1.bf16.msra.mxu0 %v5016_v19  ;;  %2634 = vmatprep.mubr.bf16.mxu0 %v5390_v57  ;;  %v4339_v19 = vld [vmem:[#allocation7 + $0x38] sm:$0xff]  }
 0x555   :  { %2604 = vmatprep.subr.bf16.mxu0 %v5018_v27  ;;  %4138 = vmatprep.mubr.msk.bf16.mxu1 %vm4576_vm1, %v5391_v14  ;;  %v5171_v27 = vld [vmem:[#allocation2 + $0xe4] ss:$16 sps:$4 sm:$0xff]  }
 0x556   :  { %4123 = vmatpush3.bf16.msra.mxu1 %v4339_v19 }
 0x557   :  { %4124 = vmatprep.subr.bf16.mxu1 %v5391_v14 }
 0x558   :  { %2605 = vmatpush1.bf16.msra.mxu0 %v5021_v25  ;;  %v5173_v25 = vld [vmem:[#allocation2 + $0xe0] ss:$16 sps:$4 sm:$0xff]  }
 0x559   :  { %2606 = vmatprep.subr.bf16.mxu0 %v5025_v30  ;;  %v4343_v30 = vld [vmem:[#allocation7 + $0x30] sm:$0xff]  }
 0x55a   :  { %4125 = vmatpush3.bf16.msra.mxu1 %v4343_v30 }
 0x55b   :  { %4126 = vmatprep.subr.bf16.mxu1 %v5391_v14 }
 0x55c   :  { %2607 = vmatpush1.bf16.msra.mxu0 %v5030_v37  ;;  %v5178_v37 = vld [vmem:[#allocation2 + $0xc4] ss:$16 sps:$4 sm:$0xff]  }
 0x55d   :  { %2608 = vmatprep.subr.bf16.mxu0 %v5033_v61  ;;  %v5180_v61 = vld [vmem:[#allocation2 + $0xc0] ss:$16 sps:$4 sm:$0xff]  }
 0x560   :  { %2609 = vmatpush1.bf16.msra.mxu0 %v5036_v4  ;;  %v4347_v4 = vld [vmem:[#allocation7 + $0x28] sm:$0xff]  }
 0x561   :  { %2610 = vmatprep.subr.bf16.mxu0 %v5039_v48  ;;  %v5185_v48 = vld [vmem:[#allocation2 + $0xa4] ss:$16 sps:$4 sm:$0xff]   ;;  %4127 = vmatpush3.bf16.msra.mxu1 %v4347_v4 }
 0x562   :  { %4128 = vmatprep.subr.bf16.mxu1 %v5391_v14 }
 0x564   :  { %2611 = vmatpush1.bf16.msra.mxu0 %v5042_v55  ;;  %v5187_v55 = vld [vmem:[#allocation2 + $0xa0] ss:$16 sps:$4 sm:$0xff]  }
 0x565   :  { %2612 = vmatprep.subr.bf16.mxu0 %v5045_v54  ;;  %v4351_v54 = vld [vmem:[#allocation7 + $0x20] sm:$0xff]  }
 0x566   :  { %4129 = vmatpush3.bf16.msra.mxu1 %v4351_v54 }
 0x567   :  { %4130 = vmatprep.subr.bf16.mxu1 %v5391_v14 }
 0x568   :  { %2613 = vmatpush1.bf16.msra.mxu0 %v5048_v51  ;;  %v5192_v51 = vld [vmem:[#allocation2 + $0x84] ss:$16 sps:$4 sm:$0xff]  }
 0x569   :  { %2614 = vmatprep.subr.bf16.mxu0 %v5051_v5  ;;  %v5194_v5 = vld [vmem:[#allocation2 + $0x80] ss:$16 sps:$4 sm:$0xff]  }
 0x56c   :  { %2615 = vmatpush1.bf16.msra.mxu0 %v5054_v52  ;;  %v4355_v52 = vld [vmem:[#allocation7 + $0x18] sm:$0xff]  }
 0x56d   :  { %2616 = vmatprep.subr.bf16.mxu0 %v5057_v32  ;;  %v5199_v32 = vld [vmem:[#allocation2 + $0x60] ss:$16 sps:$4 sm:$0xff]   ;;  %4131 = vmatpush3.bf16.msra.mxu1 %v4355_v52  ;;  %v5239_v52 = vld [vmem:[#allocation2 + $0xe8] ss:$16 sps:$4 sm:$0xff]  }
 0x56e   :  { %4132 = vmatprep.subr.bf16.mxu1 %v5391_v14 }
 0x570   :  { %2617 = vmatpush1.bf16.msra.mxu0 %v5060_v0  ;;  %v5201_v0 = vld [vmem:[#allocation2 + $0x64] ss:$16 sps:$4 sm:$0xff]  }
 0x571   :  { %2967 = vmatprep.subr.bf16.mxu0 %v5171_v27  ;;  %4133 = vmatpush3.bf16.msra.mxu1 %v4359_v40 }
 0x572   :  { %4134 = vmatprep.subr.bf16.mxu1 %v5391_v14 }
 0x573   :  { %2635 = vmatmul.mubr.bf16.vlgmr.msra.gmra.mxu0 %v2255_v36 }
 0x574   :  { %2999 = vmatprep.mubr.bf16.mxu0 %v5390_v57  ;;  %2968 = vmatpush1.bf16.msra.mxu0 %v5173_v25 }
 0x575   :  { %2969 = vmatprep.subr.bf16.mxu0 %v5178_v37  ;;  %4135 = vmatpush3.bf16.msra.mxu1 %v4363_v21  ;;  %v5241_v21 = vld [vmem:[#allocation2 + $0xcc] ss:$16 sps:$4 sm:$0xff]  }
 0x576   :  { %4136 = vmatprep.subr.bf16.mxu1 %v5391_v14 }
 0x578   :  { %2970 = vmatpush1.bf16.msra.mxu0 %v5180_v61 }
 0x579   :  { %2971 = vmatprep.subr.bf16.mxu0 %v5185_v48  ;;  %4137 = vmatpush3.bf16.msra.mxu1 %v4367_v26  ;;  %v5248_v26 = vld [vmem:[#allocation2 + $0xac] ss:$16 sps:$4 sm:$0xff]  }
 0x57a   :  { %3008 = vmatprep.subr.bf16.mxu1 %v5224_v29 }
 0x57c   :  { %2972 = vmatpush1.bf16.msra.mxu0 %v5187_v55 }
 0x57d   :  { %2973 = vmatprep.subr.bf16.mxu0 %v5192_v51 }
 0x580   :  { %2974 = vmatpush1.bf16.msra.mxu0 %v5194_v5 }
 0x581   :  { %2975 = vmatprep.subr.bf16.mxu0 %v5201_v0 }
 0x584   :  { %2976 = vmatpush1.bf16.msra.mxu0 %v5199_v32 }
 0x585   :  { %2977 = vmatprep.subr.bf16.mxu0 %v5203_v6 }
 0x588   :  { %2978 = vmatpush1.bf16.msra.mxu0 %v5208_v18 }
 0x589   :  { %2979 = vmatprep.subr.bf16.mxu0 %v5211_v20 }
 0x58c   :  { %2980 = vmatpush1.bf16.msra.mxu0 %v5215_v23 }
 0x58d   :  { %2981 = vmatprep.subr.bf16.mxu0 %v5218_v24 }
 0x590   :  { %2982 = vmatpush1.bf16.msra.mxu0 %v5222_v28 }
 0x591   :  { %4142 = vmatprep.subr.bf16.mxu0 %v5391_v14 }
 0x613   :  { %v2354_v33 = vpop.f32.mrf.mxu0  ;;  %v2595_v34 = vpop.f32.mrf.mxu1 }
 0x614   :  { %v2355_v39 = vadd.f32 %v4928_v17, %v2354_v33  ;;  %v2596_v42 = vadd.f32 %v2595_v34, %v5398_v22  ;;  %v5253_v33 = vld [vmem:[#allocation2 + $0xa8] ss:$16 sps:$4 sm:$0xff]   ;;  %v5256_v34 = vld [vmem:[#allocation2 + $0x8c] ss:$16 sps:$4 sm:$0xff]  }
 0x615   :  { %v4120_v12 = vpop.f32.mrf.mxu0  ;;  %v2597_v50 = vpop.f32.mrf.mxu1  ;;  %v5280_v22 = vld [vmem:[#allocation2 + $0xc] ss:$16 sps:$4 sm:$0xff]  }
 0x616   :  { %2361 = vst [vmem:[#allocation10 + $0x20] sm:$0xff] %v2355_v39  ;;  %v2598_v1 = vadd.f32 %v2597_v50, %v5399_v62  ;;  %v2643_v41 = vmul.f32 0.5, %v2596_v42  ;;  %v5259_v39 = vld [vmem:[#allocation2 + $0x88] ss:$16 sps:$4 sm:$0xff]   ;;  %v5262_v12 = vld [vmem:[#allocation2 + $0x6c] ss:$16 sps:$4 sm:$0xff]  }
 0x617   :  { %v2357_v13 = vpop.f32.mrf.mxu0  ;;  %v2599_v31 = vpop.f32.mrf.mxu1  ;;  %v5265_v50 = vld [vmem:[#allocation2 + $0x68] ss:$16 sps:$4 sm:$0xff]  }
 0x618   :  { %v2647_v56 = vmul.f32 0.5, %v2598_v1  ;;  %4461 = vtanh.f32 %v2643_v41  ;;  %v5268_v13 = vld [vmem:[#allocation2 + $0x4c] ss:$16 sps:$4 sm:$0xff]   ;;  %v5271_v31 = vld [vmem:[#allocation2 + $0x48] ss:$16 sps:$4 sm:$0xff]   ;;  %v5402_v41 = vld [vmem:[#allocation28_spill] sm:$0xff] }
 0x619   :  { %v4121_v46 = vpop.f32.mrf.mxu0  ;;  %v2600_v38 = vpop.f32.mrf.mxu1  ;;  %v5283_v42 = vld [vmem:[#allocation2 + $0x8] ss:$16 sps:$4 sm:$0xff]  }
 0x61a   :  { %4463 = vtanh.f32 %v2647_v56  ;;  %v5274_v46 = vld [vmem:[#allocation2 + $0x2c] ss:$16 sps:$4 sm:$0xff]   ;;  %v5277_v38 = vld [vmem:[#allocation2 + $0x28] ss:$16 sps:$4 sm:$0xff]  }
 0x625   :  { %v4462_v43 = vpop.eup %4461 }
 0x626   :  { %v2645_v3 = vadd.f32 1.0, %v4462_v43 }
 0x627   :  { %v4464_v63 = vpop.eup %4463 }
 0x628   :  { %v2649_v7 = vadd.f32 1.0, %v4464_v63  ;;  %v2646_v49 = vmul.f32 0.5, %v2645_v3  ;;  %v5405_v63 = vld [vmem:[#allocation29_spill] sm:$0xff] }
 0x62a   :  { %v2650_v10 = vmul.f32 0.5, %v2649_v7  ;;  %v2656_v15 = vmul.f32 %v2646_v49, %v5149_v8  ;;  %v5244_v8 = vld [vmem:[#allocation2 + $0xc8] ss:$16 sps:$4 sm:$0xff]  }
 0x633   :  { %v2636_v2 = vpop.f32.mrf.mxu0 }
 0x634   :  { %v2637_v60 = vadd.f32 %v2636_v2, %v5401_v59  ;;  %v5403_v2 = vld [vmem:[#allocation30_spill] sm:$0xff] }
 0x635   :  { %v2638_v9 = vpop.f32.mrf.mxu0 }
 0x636   :  { %v2639_v58 = vadd.f32 %v2638_v9, %v5400_v47  ;;  %v2651_v45 = vmul.f32 0.5, %v2637_v60 }
 0x637   :  { %v2640_v17 = vpop.f32.mrf.mxu0 }
 0x638   :  { %4465 = vtanh.f32 %v2639_v58 }
 0x639   :  { %v2641_v53 = vpop.f32.mrf.mxu0  ;;  %4467 = vtanh.f32 %v2651_v45 }
 0x63a   :  { %v5404_v53 = vld [vmem:[#allocation31_spill] sm:$0xff] }
 0x645   :  { %v4466_v11 = vpop.eup %4465 }
 0x646   :  { %v2657_v16 = vmul.f32 %v4466_v11, %v2650_v10  ;;  %v4468_v36 = vpop.eup %4467 }
 0x647   :  { %v2653_v19 = vadd.f32 1.0, %v4468_v36 }
 0x648   :  { %v5236_v35 = vadd.f32 %v2657_v16, %v2656_v15 }
 0x649   :  { %v2654_v30 = vmul.f32 0.5, %v2653_v19 }
 0x64a   :  { %4469 = vtanh.f32 %v5236_v35 }
 0x657   :  { %v4470_v4 = vpop.eup %4469 }
 0x658   :  { %v2660_v54 = vmul.f32 %v4470_v4, %v2654_v30 }
 0x65a   :  { %v2661_v40 = vpack.c.bf16 %v2660_v54, %v2660_v54 }
 0x65c   :  { %4139 = vmatmul.mubr.bf16.vlgmr.msra.gmra.mxu1 %v2661_v40  ;;  %3000 = vmatmul.mubr.bf16.vlgmr.msra.gmra.mxu0 %v2661_v40 }
 0x65d   :  { %3009 = vmatpush1.bf16.msra.mxu1 %v5239_v52  ;;  %3040 = vmatprep.mubr.bf16.mxu1 %v5390_v57 }
 0x65e   :  { %3010 = vmatprep.subr.bf16.mxu1 %v5241_v21  ;;  %4158 = vmatprep.mubr.msk.bf16.mxu0 %vm4576_vm1, %v5391_v14 }
 0x661   :  { %3011 = vmatpush1.bf16.msra.mxu1 %v5244_v8 }
 0x662   :  { %3012 = vmatprep.subr.bf16.mxu1 %v5248_v26 }
 0x665   :  { %3013 = vmatpush1.bf16.msra.mxu1 %v5253_v33 }
 0x666   :  { %3014 = vmatprep.subr.bf16.mxu1 %v5256_v34 }
 0x669   :  { %3015 = vmatpush1.bf16.msra.mxu1 %v5259_v39 }
 0x66a   :  { %3016 = vmatprep.subr.bf16.mxu1 %v5262_v12 }
 0x66d   :  { %3017 = vmatpush1.bf16.msra.mxu1 %v5265_v50 }
 0x66e   :  { %3018 = vmatprep.subr.bf16.mxu1 %v5268_v13 }
 0x671   :  { %3019 = vmatpush1.bf16.msra.mxu1 %v5271_v31 }
 0x672   :  { %3020 = vmatprep.subr.bf16.mxu1 %v5274_v46 }
 0x675   :  { %3021 = vmatpush1.bf16.msra.mxu1 %v5277_v38 }
 0x676   :  { %3022 = vmatprep.subr.bf16.mxu1 %v5280_v22 }
 0x679   :  { %3023 = vmatpush1.bf16.msra.mxu1 %v5283_v42 }
 0x67a   :  { %3373 = vmatprep.subr.bf16.mxu1 %v5171_v27  ;;  %v4395_v27 = vld [vmem:[#allocation7 + $0x38] sm:$0xff]  }
 0x67b   :  { %4143 = vmatpush3.bf16.msra.mxu0 %v4395_v27 }
 0x67c   :  { %3041 = vmatmul.mubr.bf16.vlgmr.msra.gmra.mxu1 %v2661_v40  ;;  %4144 = vmatprep.subr.bf16.mxu0 %v5391_v14 }
 0x67d   :  { %3374 = vmatpush1.bf16.msra.mxu1 %v5173_v25  ;;  %3405 = vmatprep.mubr.bf16.mxu1 %v5390_v57  ;;  %v4396_v25 = vld [vmem:[#allocation7 + $0x30] sm:$0xff]  }
 0x67e   :  { %3375 = vmatprep.subr.bf16.mxu1 %v5178_v37  ;;  %v4397_v37 = vld [vmem:[#allocation7 + $0x28] sm:$0xff]  }
 0x67f   :  { %4145 = vmatpush3.bf16.msra.mxu0 %v4396_v25 }
 0x680   :  { %4146 = vmatprep.subr.bf16.mxu0 %v5391_v14 }
 0x681   :  { %3376 = vmatpush1.bf16.msra.mxu1 %v5180_v61  ;;  %v4398_v61 = vld [vmem:[#allocation7 + $0x20] sm:$0xff]  }
 0x682   :  { %3377 = vmatprep.subr.bf16.mxu1 %v5185_v48  ;;  %v4399_v48 = vld [vmem:[#allocation7 + $0x18] sm:$0xff]  }
 0x683   :  { %4147 = vmatpush3.bf16.msra.mxu0 %v4397_v37 }
 0x684   :  { %4148 = vmatprep.subr.bf16.mxu0 %v5391_v14 }
 0x685   :  { %3378 = vmatpush1.bf16.msra.mxu1 %v5187_v55  ;;  %v4400_v55 = vld [vmem:[#allocation7 + $0x10] sm:$0xff]  }
 0x686   :  { %3379 = vmatprep.subr.bf16.mxu1 %v5192_v51  ;;  %v4401_v51 = vld [vmem:[#allocation7 + $0x8] sm:$0xff]  }
 0x687   :  { %4149 = vmatpush3.bf16.msra.mxu0 %v4398_v61 }
 0x688   :  { %4150 = vmatprep.subr.bf16.mxu0 %v5391_v14 }
 0x689   :  { %3380 = vmatpush1.bf16.msra.mxu1 %v5194_v5  ;;  %v4402_v5 = vld [vmem:[#allocation7] sm:$0xff]  }
 0x68a   :  { %3381 = vmatprep.subr.bf16.mxu1 %v5201_v0 }
 0x68b   :  { %4151 = vmatpush3.bf16.msra.mxu0 %v4399_v48  ;;  %v5406_v48 = vld [vmem:[#allocation32_spill] sm:$0xff] }
 0x68c   :  { %4152 = vmatprep.subr.bf16.mxu0 %v5391_v14 }
 0x68d   :  { %3382 = vmatpush1.bf16.msra.mxu1 %v5199_v32 }
 0x68e   :  { %3383 = vmatprep.subr.bf16.mxu1 %v5203_v6  ;;  %v5316_v6 = vld [vmem:[%s5367_s5] ss:$0 sm:$0xff]  ;;  %s4577_s5 = smov [#allocation10]  }
 0x68f   :  { %4153 = vmatpush3.bf16.msra.mxu0 %v4400_v55  ;;  %s3587_s26 = sshll.u32 %s4577_s5, 4  ;;  %s3588_s26 = int_to_ptr.vmem [resolvable:$true] %s3587_s26 }
 0x690   :  { %4154 = vmatprep.subr.bf16.mxu0 %v5391_v14  ;;  %s4543_s27 = scalar_lea.vmem %s3588_s26, 1024  ;;  %p4548_p11 = scmp.lt.s32.totalorder %s3588_s26, %s3588_s26 }
 0x691   :  { %3384 = vmatpush1.bf16.msra.mxu1 %v5208_v18  ;;  %p4544_p10 = scmp.ne.s32.totalorder %s3588_s26, %s4543_s27  ;;  %p4549_p12 = scmp.lt.s32.totalorder %s4543_s27, %s4543_s27 }
 0x692   :  { %3385 = vmatprep.subr.bf16.mxu1 %v5211_v20 }
 0x693   :  { %4155 = vmatpush3.bf16.msra.mxu0 %v4401_v51  ;;  %p4550_p13 = por %p4549_p12, %p4548_p11 }
 0x694   :  { %4156 = vmatprep.subr.bf16.mxu0 %v5391_v14 }
 0x695   :  { %3386 = vmatpush1.bf16.msra.mxu1 %v5215_v23  ;;  %p4551_p0 = pnand %p4550_p13, %p4544_p10 }
 0x696   :  { %3387 = vmatprep.subr.bf16.mxu1 %v5218_v24 }
 0x697   :  { %4157 = vmatpush3.bf16.msra.mxu0 %v4402_v5 }
 0x698   :  { %3414 = vmatprep.subr.bf16.mxu0 %v5224_v29 }
 0x699   :  { %3388 = vmatpush1.bf16.msra.mxu1 %v5222_v28 }
 0x69a   :  { %4162 = vmatprep.subr.bf16.mxu1 %v5391_v14 }
 0x71c   :  { %v2760_v32 = vpop.f32.mrf.mxu1  ;;  %v3001_v0 = vpop.f32.mrf.mxu0 }
 0x71d   :  { %v2761_v18 = vadd.f32 %v5316_v6, %v2760_v32  ;;  %v3002_v56 = vadd.f32 %v3001_v0, %v5402_v41 }
 0x71e   :  { %v4140_v20 = vpop.f32.mrf.mxu1  ;;  %v3003_v23 = vpop.f32.mrf.mxu0 }
 0x71f   :  { %2767 = vst [vmem:[#allocation10 + $0x28] sm:$0xff] %v2761_v18  ;;  %v3004_v29 = vadd.f32 %v3003_v23, %v5403_v2  ;;  %v3049_v9 = vmul.f32 0.5, %v3002_v56  ;;  %v5407_v18 = vld [vmem:[#allocation34_spill] sm:$0xff] }
 0x720   :  { %v2763_v24 = vpop.f32.mrf.mxu1  ;;  %v3005_v28 = vpop.f32.mrf.mxu0 }
 0x721   :  { %v3053_v47 = vmul.f32 0.5, %v3004_v29  ;;  %4471 = vtanh.f32 %v3049_v9  ;;  %v5408_v28 = vld [vmem:[#allocation33_spill] sm:$0xff] }
 0x722   :  { %v4141_v62 = vpop.f32.mrf.mxu1  ;;  %v3006_v1 = vpop.f32.mrf.mxu0 }
 0x723   :  { %4473 = vtanh.f32 %v3053_v47 }
 0x72e   :  { %v4472_v45 = vpop.eup %4471 }
 0x72f   :  { %v3051_v49 = vadd.f32 1.0, %v4472_v45 }
 0x730   :  { %v4474_v7 = vpop.eup %4473 }
 0x731   :  { %v3055_v11 = vadd.f32 1.0, %v4474_v7  ;;  %v3052_v15 = vmul.f32 0.5, %v3051_v49 }
 0x733   :  { %v3056_v16 = vmul.f32 0.5, %v3055_v11  ;;  %v3062_v19 = vmul.f32 %v3052_v15, %v5236_v35  ;;  %v4404_v35 = vld [vmem:[#allocation7 + $0x30] sm:$0xff]  }
 0x73c   :  { %v3042_v58 = vpop.f32.mrf.mxu1 }
 0x73d   :  { %v3043_v3 = vadd.f32 %v3042_v58, %v5405_v63 }
 0x73e   :  { %v3044_v17 = vpop.f32.mrf.mxu1 }
 0x73f   :  { %v3045_v59 = vadd.f32 %v3044_v17, %v5404_v53  ;;  %v3057_v10 = vmul.f32 0.5, %v3043_v3 }
 0x740   :  { %v3046_v60 = vpop.f32.mrf.mxu1 }
 0x741   :  { %4475 = vtanh.f32 %v3045_v59 }
 0x742   :  { %v3047_v43 = vpop.f32.mrf.mxu1  ;;  %4477 = vtanh.f32 %v3057_v10 }
 0x74e   :  { %v4476_v36 = vpop.eup %4475 }
 0x74f   :  { %v3063_v30 = vmul.f32 %v4476_v36, %v3056_v16  ;;  %v4478_v54 = vpop.eup %4477 }
 0x750   :  { %v3059_v40 = vadd.f32 1.0, %v4478_v54 }
 0x751   :  { %v5324_v4 = vadd.f32 %v3063_v30, %v3062_v19 }
 0x752   :  { %v3060_v27 = vmul.f32 0.5, %v3059_v40 }
 0x753   :  { %4479 = vtanh.f32 %v5324_v4 }
 0x760   :  { %v4480_v25 = vpop.eup %4479 }
 0x761   :  { %v3066_v37 = vmul.f32 %v4480_v25, %v3060_v27 }
 0x763   :  { %v3067_v61 = vpack.c.bf16 %v3066_v37, %v3066_v37 }
 0x765   :  { %4159 = vmatmul.mubr.bf16.vlgmr.msra.gmra.mxu0 %v3067_v61  ;;  %3406 = vmatmul.mubr.bf16.vlgmr.msra.gmra.mxu1 %v3067_v61 }
 0x766   :  { %3415 = vmatpush1.bf16.msra.mxu0 %v5239_v52  ;;  %3446 = vmatprep.mubr.bf16.mxu0 %v5390_v57  ;;  %v4403_v57 = vld [vmem:[#allocation7 + $0x38] sm:$0xff]   ;;  %v4405_v52 = vld [vmem:[#allocation7 + $0x28] sm:$0xff]  }
 0x767   :  { %3416 = vmatprep.subr.bf16.mxu0 %v5241_v21  ;;  %4178 = vmatprep.mubr.msk.bf16.mxu1 %vm4576_vm1, %v5391_v14  ;;  %v4406_v21 = vld [vmem:[#allocation7 + $0x20] sm:$0xff]  }
 0x768   :  { %4163 = vmatpush3.bf16.msra.mxu1 %v4403_v57 }
 0x769   :  { %4164 = vmatprep.subr.bf16.mxu1 %v5391_v14 }
 0x76a   :  { %3417 = vmatpush1.bf16.msra.mxu0 %v5244_v8  ;;  %v4407_v8 = vld [vmem:[#allocation7 + $0x18] sm:$0xff]  }
 0x76b   :  { %3418 = vmatprep.subr.bf16.mxu0 %v5248_v26  ;;  %v4408_v26 = vld [vmem:[#allocation7 + $0x10] sm:$0xff]  }
 0x76c   :  { %4165 = vmatpush3.bf16.msra.mxu1 %v4404_v35 }
 0x76d   :  { %4166 = vmatprep.subr.bf16.mxu1 %v5391_v14 }
 0x76e   :  { %3419 = vmatpush1.bf16.msra.mxu0 %v5253_v33  ;;  %v4409_v33 = vld [vmem:[#allocation7 + $0x8] sm:$0xff]  }
 0x76f   :  { %3420 = vmatprep.subr.bf16.mxu0 %v5256_v34  ;;  %v4410_v34 = vld [vmem:[#allocation7] sm:$0xff]  }
 0x770   :  { %4167 = vmatpush3.bf16.msra.mxu1 %v4405_v52 }
 0x771   :  { %4168 = vmatprep.subr.bf16.mxu1 %v5391_v14 }
 0x772   :  { %3421 = vmatpush1.bf16.msra.mxu0 %v5259_v39 }
 0x773   :  { %3422 = vmatprep.subr.bf16.mxu0 %v5262_v12 }
 0x774   :  { %4169 = vmatpush3.bf16.msra.mxu1 %v4406_v21 }
 0x775   :  { %4170 = vmatprep.subr.bf16.mxu1 %v5391_v14 }
 0x776   :  { %3423 = vmatpush1.bf16.msra.mxu0 %v5265_v50 }
 0x777   :  { %3424 = vmatprep.subr.bf16.mxu0 %v5268_v13 }
 0x778   :  { %4171 = vmatpush3.bf16.msra.mxu1 %v4407_v8 }
 0x779   :  { %4172 = vmatprep.subr.bf16.mxu1 %v5391_v14 }
 0x77a   :  { %3425 = vmatpush1.bf16.msra.mxu0 %v5271_v31 }
 0x77b   :  { %3426 = vmatprep.subr.bf16.mxu0 %v5274_v46 }
 0x77c   :  { %4173 = vmatpush3.bf16.msra.mxu1 %v4408_v26 }
 0x77d   :  { %4174 = vmatprep.subr.bf16.mxu1 %v5391_v14 }
 0x77e   :  { %3427 = vmatpush1.bf16.msra.mxu0 %v5277_v38 }
 0x77f   :  { %3428 = vmatprep.subr.bf16.mxu0 %v5280_v22 }
 0x780   :  { %4175 = vmatpush3.bf16.msra.mxu1 %v4409_v33 }
 0x781   :  { %4176 = vmatprep.subr.bf16.mxu1 %v5391_v14 }
 0x782   :  { %3429 = vmatpush1.bf16.msra.mxu0 %v5283_v42 }
 0x784   :  { %4177 = vmatpush3.bf16.msra.mxu1 %v4410_v34 }
 0x785   :  { %3447 = vmatmul.mubr.bf16.vlgmr.msra.gmra.mxu0 %v3067_v61 }
 0x825   :  { %v3166_v39 = vpop.f32.mrf.mxu0  ;;  %v3407_v12 = vpop.f32.mrf.mxu1 }
 0x826   :  { %v3167_v50 = vadd.f32 %v5316_v6, %v3166_v39  ;;  %v3408_v55 = vadd.f32 %v3407_v12, %v5406_v48 }
 0x827   :  { %v4160_v13 = vpop.f32.mrf.mxu0  ;;  %v3409_v31 = vpop.f32.mrf.mxu1 }
 0x828   :  { %3173 = vst [vmem:[#allocation10 + $0x30] sm:$0xff] %v3167_v50  ;;  %v3410_v51 = vadd.f32 %v3409_v31, %v4869_v44  ;;  %v3455_v5 = vmul.f32 0.5, %v3408_v55 }
 0x829   :  { %v3169_v46 = vpop.f32.mrf.mxu0  ;;  %v3411_v38 = vpop.f32.mrf.mxu1 }
 0x82a   :  { %v3459_v32 = vmul.f32 0.5, %v3410_v51  ;;  %4481 = vtanh.f32 %v3455_v5 }
 0x82b   :  { %v4161_v22 = vpop.f32.mrf.mxu0  ;;  %v3412_v42 = vpop.f32.mrf.mxu1 }
 0x82c   :  { %4483 = vtanh.f32 %v3459_v32 }
 0x837   :  { %v4482_v1 = vpop.eup %4481 }
 0x838   :  { %v3457_v56 = vadd.f32 1.0, %v4482_v1 }
 0x839   :  { %v4484_v41 = vpop.eup %4483 }
 0x83a   :  { %v3461_v29 = vadd.f32 1.0, %v4484_v41  ;;  %v3458_v9 = vmul.f32 0.5, %v3457_v56 }
 0x83c   :  { %v3462_v44 = vmul.f32 0.5, %v3461_v29  ;;  %v3468_v58 = vmul.f32 %v3458_v9, %v5324_v4 }
 0x845   :  { %v3448_v14 = vpop.f32.mrf.mxu0 }
 0x846   :  { %v3449_v62 = vadd.f32 %v3448_v14, %v5408_v28 }
 0x847   :  { %v3450_v0 = vpop.f32.mrf.mxu0 }
 0x848   :  { %v3451_v20 = vadd.f32 %v3450_v0, %v5407_v18  ;;  %v3463_v2 = vmul.f32 0.5, %v3449_v62 }
 0x849   :  { %v3452_v23 = vpop.f32.mrf.mxu0 }
 0x84a   :  { %4485 = vtanh.f32 %v3451_v20 }
 0x84b   :  { %v3453_v24 = vpop.f32.mrf.mxu0  ;;  %4487 = vtanh.f32 %v3463_v2 }
 0x857   :  { %v4486_v47 = vpop.eup %4485 }
 0x858   :  { %v3469_v17 = vmul.f32 %v4486_v47, %v3462_v44  ;;  %v4488_v59 = vpop.eup %4487 }
 0x859   :  { %v3465_v60 = vadd.f32 1.0, %v4488_v59 }
 0x85a   :  { %v3470_v53 = vadd.f32 %v3469_v17, %v3468_v58 }
 0x85b   :  { %v3466_v43 = vmul.f32 0.5, %v3465_v60 }
 0x85c   :  { %4489 = vtanh.f32 %v3470_v53 }
 0x869   :  { %v4490_v63 = vpop.eup %4489 }
 0x86a   :  { %v3472_v3 = vmul.f32 %v4490_v63, %v3466_v43 }
 0x86c   :  { %v3473_v45 = vpack.c.bf16 %v3472_v3, %v3472_v3 }
 0x86e   :  { %4179 = vmatmul.mubr.bf16.vlgmr.msra.gmra.mxu1 %v3473_v45 }
 0x92e   :  { %v3572_v7 = vpop.f32.mrf.mxu1 }
 0x92f   :  { %v3573_v49 = vadd.f32 %v5316_v6, %v3572_v7 }
 0x930   :  { %v4180_v10 = vpop.f32.mrf.mxu1 }
 0x931   :  { %3579 = vst [vmem:[#allocation10 + $0x38] sm:$0xff] %v3573_v49 }
 0x932   :  { %v3575_v11 = vpop.f32.mrf.mxu1 }
 0x933   :  { %4554 = shalt.err (!%p4551_p0)
}
 0x934   :  { %s4578_s28 = smov 128   ;;  %s4579_s29 = smov 8   ;;  %v4181_v15 = vpop.f32.mrf.mxu1 }
 0x935   :  { %3593 = dma.vmem_to_hbm [thread:$0]  %s3588_s26, 1024, %s5368_s6, [#allocation9], %s4578_s28, %s4578_s28, %s4579_s29  }
 0x936   :  { %4567 = dma.done.wait [#allocation9], 1024  }
 0x937   :  { %4568 = vsyncadd [#allocation9], 4294966272 }
 0x938   :  { %3597 = vsyncpa [#allocation8], 1 }
 0x939   :  { %3598 = vsyncpa [#allocation9], 1 }
 0x93a   :  { %3599 = vsyncmov [#allocation6] }
 0x93d   :  { %s3600_s8 = vpop.sfrf %3599 }
 0x93e   :  { %p3949_p1 = scmp.ne.s32.totalorder %s3600_s8, 0 }
 0x940   :  { %3604 = shalt.err (%p3949_p1)  }

</bundles_post_ra>
